<compile_context>
chip_gen: v6e
topology: v6e:2x2x1
jax: 0.10.0
libtpu: 0.0.40
codegen_flags: <defaults>
</compile_context>

<pallas_src>
import numpy as np
import jax
import jax.numpy as jnp
from jax.experimental import pallas as pl
from jax.experimental.pallas import tpu as pltpu

# --- Constants baked from PMEkernel(14, 15, 16, 5, alpha, coulomb, zeros(9, 0)) ---
GRIDX, GRIDY, GRIDZ = 14, 15, 16
ORDER = 5
ALPHA = 4.985823141035867
COULOMB = 138.935
CUTOFF = 0.5            # literal passed to compute_direct in forward()
NATOMS = 9              # exclusions tensor (9, 0) -> 9 atoms, no exclusions
NP_ATOMS = 16           # atoms padded to 16

NK = GRIDX + GRIDY + GRIDZ          # 45  (total spline columns, all axes)
NKXY = GRIDX * GRIDY                # 210 (flattened (m1, m2) pair index)
# lane offsets of [cos|sin] blocks in the fused spread-DFT result (NP, 2*NK)
_O1C, _O1S = 0, GRIDX
_O2C = 2 * GRIDX
_O2S = _O2C + GRIDY
_O3C = _O2S + GRIDY
_O3S = _O3C + GRIDZ
_SELF_COEF = float(-COULOMB * ALPHA / np.sqrt(np.pi))


# ------------------------------ in-kernel helpers ------------------------------

def _erfc(x):
    # Abramowitz & Stegun 7.1.26 rational approximation (|err| < 1.5e-7, f32-accurate).
    # TODO(synk): replace with native erfc if/when Mosaic exposes an erf lowering.
    t = 1.0 / (1.0 + 0.3275911 * x)
    poly = t * (0.254829592 + t * (-0.284496736 + t * (1.421413741
               + t * (-1.453152027 + t * 1.061405429))))
    return poly * jnp.exp(-x * x)


def _m5(x):
    # Cardinal B-spline of order 5 (support (0, 5)) via the standard recursion (VPU only).
    def m2(y):
        return jnp.where((y > 0.0) & (y < 2.0), 1.0 - jnp.abs(y - 1.0), 0.0)

    def m3(y):
        return (y * m2(y) + (3.0 - y) * m2(y - 1.0)) / 2.0

    def m4(y):
        return (y * m3(y) + (4.0 - y) * m3(y - 1.0)) / 3.0

    return (x * m4(x) + (5.0 - x) * m4(x - 1.0)) / 4.0


# ------------------------------ fused PME kernel ------------------------------
# pos_row: (8, NP)  rows = [x, y, z, q, mask, u1, u2, u3]   (atoms on lanes)
# pos_col: (NP, 8)  columns in the same order               (atoms on sublanes)
# box    : (3, 3)   SMEM (scalar reads)
# axtab  : (6, NK)  rows = [k-offset, K, 1/K, sel_x, sel_y, sel_z] per spline column
# dft    : (NK, 2*NK) block-diagonal [cosX|sinX ; cosY|sinY ; cosZ|sinZ]
# e1     : (GRIDX, NKXY), e2: (GRIDY, NKXY) one-hot pair-expansion matrices
# eterm  : (GRIDZ, NKXY)  0.5 * exp(-pi^2 m^2/a^2) * coulomb/(pi*V*m^2*B(m)), 0 at m=0
# out    : (8, 128) block per phase; energy broadcast over the block.

def _pme_kernel(pos_row_ref, pos_col_ref, box_ref, axtab_ref, dft_ref,
                e1_ref, e2_ref, eterm_ref, out_ref):
    phase = pl.program_id(0)

    # ---------------- phase 0: direct (real-space) energy ----------------
    @pl.when(phase == 0)
    def _direct():
        px = pos_row_ref[0:1, :]
        py = pos_row_ref[1:2, :]
        pz = pos_row_ref[2:3, :]
        dx = pos_col_ref[:, 0:1] - px          # (NP, NP): x_i - x_j
        dy = pos_col_ref[:, 1:2] - py
        dz = pos_col_ref[:, 2:3] - pz

        # Minimum image, OpenMM reduced-form box rows a=(ax,0,0), b=(bx,by,0), c=(cx,cy,cz)
        ax = box_ref[0, 0]
        bx = box_ref[1, 0]
        by = box_ref[1, 1]
        cx = box_ref[2, 0]
        cy = box_ref[2, 1]
        cz = box_ref[2, 2]
        s = jnp.floor(dz / cz + 0.5)
        dx = dx - s * cx
        dy = dy - s * cy
        dz = dz - s * cz
        s = jnp.floor(dy / by + 0.5)
        dx = dx - s * bx
        dy = dy - s * by
        s = jnp.floor(dx / ax + 0.5)
        dx = dx - s * ax

        r2 = dx * dx + dy * dy + dz * dz

        qq = pos_col_ref[:, 3:4] * pos_row_ref[3:4, :]      # (NP, NP) q_i * q_j
        pm = pos_col_ref[:, 4:5] * pos_row_ref[4:5, :]      # pair mask
        ii = jax.lax.broadcasted_iota(jnp.int32, (NP_ATOMS, NP_ATOMS), 0)
        jj = jax.lax.broadcasted_iota(jnp.int32, (NP_ATOMS, NP_ATOMS), 1)
        valid = (pm > 0.5) & (ii != jj) & (r2 < CUTOFF * CUTOFF)

        r = jnp.sqrt(jnp.where(valid, r2, 1.0))
        e_pair = jnp.where(valid, qq * _erfc(ALPHA * r) / r, 0.0)
        edir = 0.5 * COULOMB * jnp.sum(e_pair)              # 0.5: each pair counted twice
        out_ref[...] = jnp.broadcast_to(edir, (8, 128)).astype(jnp.float32)

    # ---------------- phase 1: reciprocal-space energy ----------------
    # F(m1,m2,m3) = sum_j q_j f1_j(m1) f2_j(m2) f3_j(m3),
    # f_d,j(m) = sum_k M5((u_dj - k) mod K_d) e^{2*pi*i*m*k/K_d}
    # E_rec = sum_m eterm(m) |F(m)|^2 - coulomb*a/sqrt(pi) * sum_j q_j^2
    @pl.when(phase == 1)
    def _recip():
        q_col = pos_col_ref[:, 3:4]                         # (NP, 1), zero for padding
        u1 = pos_col_ref[:, 5:6]
        u2 = pos_col_ref[:, 6:7]
        u3 = pos_col_ref[:, 7:8]

        koff = axtab_ref[0:1, :]                            # (1, NK)
        kmod = axtab_ref[1:2, :]
        kinv = axtab_ref[2:3, :]
        selx = axtab_ref[3:4, :]
        sely = axtab_ref[4:5, :]
        selz = axtab_ref[5:6, :]

        # per-atom scaled fractional coord replicated over that axis' spline columns
        u_all = u1 * selx + u2 * sely + u3 * selz           # (NP, NK)
        w = u_all - koff
        w = w - jnp.floor(w * kinv) * kmod                  # mod K_d
        w_spl = _m5(w)                                      # (NP, NK) B-spline weights

        # one fused spread-DFT matmul: all 3 axes, cos & sin at once
        r_all = jnp.dot(w_spl, dft_ref[...],
                        preferred_element_type=jnp.float32)  # (NP, 2*NK)
        fc1 = r_all[:, _O1C:_O1S]
        fs1 = r_all[:, _O1S:_O2C]
        fc2 = r_all[:, _O2C:_O2S]
        fs2 = r_all[:, _O2S:_O3C]
        fc3 = r_all[:, _O3C:_O3S]
        fs3 = r_all[:, _O3S:]

        # expand axis-1 / axis-2 factors onto the flattened (m1, m2) lane index
        c1 = jnp.dot(fc1, e1_ref[...], preferred_element_type=jnp.float32)  # (NP, NKXY)
        s1 = jnp.dot(fs1, e1_ref[...], preferred_element_type=jnp.float32)
        c2 = jnp.dot(fc2, e2_ref[...], preferred_element_type=jnp.float32)
        s2 = jnp.dot(fs2, e2_ref[...], preferred_element_type=jnp.float32)

        g_re = q_col * (c1 * c2 - s1 * s2)                  # (NP, NKXY)
        g_im = q_col * (c1 * s2 + s1 * c2)

        # contract over atoms with the axis-3 factors -> (K3, K1*K2), lane-dense
        fc3t = jnp.transpose(fc3)                           # (K3, NP)
        fs3t = jnp.transpose(fs3)
        t_re = (jnp.dot(fc3t, g_re, preferred_element_type=jnp.float32)
                - jnp.dot(fs3t, g_im, preferred_element_type=jnp.float32))
        t_im = (jnp.dot(fs3t, g_re, preferred_element_type=jnp.float32)
                + jnp.dot(fc3t, g_im, preferred_element_type=jnp.float32))
        struct2 = t_re * t_re + t_im * t_im                 # |F|^2, (K3, NKXY)

        erec = jnp.sum(eterm_ref[...] * struct2)            # 0.5 folded into eterm
        qrow = pos_row_ref[3:4, :]
        self_e = _SELF_COEF * jnp.sum(qrow * qrow)
        out_ref[...] = jnp.broadcast_to(erec + self_e, (8, 128)).astype(jnp.float32)


# ------------------------------ host-side constants ------------------------------

def _bspline_moduli(K):
    # |DFT of the order-5 cardinal B-spline sampled at integers|^2 with the
    # OpenMM/GROMACS fix-up for (near-)zero entries.  Pure constants.
    data = np.zeros(K, dtype=np.float64)
    data[1:ORDER] = np.array([1.0, 11.0, 11.0, 1.0]) / 24.0      # M5(1..4)
    ang = 2.0 * np.pi * np.outer(np.arange(K), np.arange(K)) / K
    sc = (data[None, :] * np.cos(ang)).sum(axis=1)
    ss = (data[None, :] * np.sin(ang)).sum(axis=1)
    mod = sc * sc + ss * ss
    for i in range(K):
        if mod[i] < 1e-7:
            mod[i] = 0.5 * (mod[(i - 1) % K] + mod[(i + 1) % K])
    return mod


_BSPMOD_X = _bspline_moduli(GRIDX)
_BSPMOD_Y = _bspline_moduli(GRIDY)
_BSPMOD_Z = _bspline_moduli(GRIDZ)


def _build_constants():
    ks = (GRIDX, GRIDY, GRIDZ)
    # block-diagonal spread-DFT matrix [cos | sin] per axis
    dft = np.zeros((NK, 2 * NK), np.float32)
    ro = co = 0
    for K in ks:
        kk = np.arange(K)
        ang = 2.0 * np.pi * np.outer(kk, kk) / K
        dft[ro:ro + K, co:co + K] = np.cos(ang)
        dft[ro:ro + K, co + K:co + 2 * K] = np.sin(ang)
        ro += K
        co += 2 * K
    # one-hot pair-expansion matrices onto the flattened (m1, m2) index m1*K2 + m2
    e1 = np.zeros((GRIDX, NKXY), np.float32)
    e2 = np.zeros((GRIDY, NKXY), np.float32)
    for m1 in range(GRIDX):
        e1[m1, m1 * GRIDY:(m1 + 1) * GRIDY] = 1.0
        for m2 in range(GRIDY):
            e2[m2, m1 * GRIDY + m2] = 1.0
    # per-column axis tables: [k-offset, K, 1/K, sel_x, sel_y, sel_z]
    axtab = np.zeros((6, NK), np.float32)
    off = 0
    for d, K in enumerate(ks):
        axtab[0, off:off + K] = np.arange(K)
        axtab[1, off:off + K] = K
        axtab[2, off:off + K] = 1.0 / K
        axtab[3 + d, off:off + K] = 1.0
        off += K
    return dft, e1, e2, axtab


_DFT_BLK, _E1, _E2, _AXTAB = _build_constants()


def _eterm_table(invbox, vol):
    # 0.5 * exp(-pi^2 m^2/a^2) * coulomb / (pi*V*m^2*B(m)), zero at m=0,
    # laid out as (K3, K1*K2) so it matches the kernel's lane-dense |F|^2 tile.
    def freqs(K):
        k = jnp.arange(K)
        return jnp.where(k < (K + 1) // 2, k, k - K).astype(jnp.float32)

    m1 = freqs(GRIDX)
    m2 = freqs(GRIDY)
    m3 = freqs(GRIDZ)
    mh = (m1[:, None, None, None] * invbox[None, None, None, :, 0]
          + m2[None, :, None, None] * invbox[None, None, None, :, 1]
          + m3[None, None, :, None] * invbox[None, None, None, :, 2])
    msq = jnp.sum(mh * mh, axis=-1)                                  # (K1, K2, K3)
    bprod = (jnp.asarray(_BSPMOD_X, jnp.float32)[:, None, None]
             * jnp.asarray(_BSPMOD_Y, jnp.float32)[None, :, None]
             * jnp.asarray(_BSPMOD_Z, jnp.float32)[None, None, :])
    msq_safe = jnp.where(msq > 0, msq, 1.0)
    eterm = jnp.where(
        msq > 0,
        jnp.exp((-(np.pi ** 2) / (ALPHA ** 2)) * msq)
        * COULOMB / (np.pi * vol * msq_safe * bprod),
        0.0)
    eterm_t = jnp.transpose(eterm, (2, 0, 1)).reshape(GRIDZ, NKXY)   # [m3, m1*K2+m2]
    return (0.5 * eterm_t).astype(jnp.float32)


# ------------------------------ forward wrapper ------------------------------

@jax.jit
def pme_forward(positions, charges, box_vectors):
    positions = jnp.asarray(positions, jnp.float32)     # (N, 3)
    charges = jnp.asarray(charges, jnp.float32)         # (N,)
    box = jnp.asarray(box_vectors, jnp.float32)         # (3, 3), rows are box vectors

    n = positions.shape[0]
    pos_p = jnp.zeros((NP_ATOMS, 3), jnp.float32).at[:n].set(positions)
    q_p = jnp.zeros((NP_ATOMS,), jnp.float32).at[:n].set(charges)
    mask = jnp.zeros((NP_ATOMS,), jnp.float32).at[:n].set(1.0)

    invbox = jnp.linalg.inv(box)
    vol = jnp.abs(jnp.linalg.det(box))
    u = (pos_p @ invbox) * jnp.asarray([GRIDX, GRIDY, GRIDZ], jnp.float32)   # (NP, 3)

    # per-atom data in both orientations (avoids all in-kernel transposes)
    pos_col = jnp.concatenate([pos_p, q_p[:, None], mask[:, None], u], axis=1)  # (NP, 8)
    pos_row = jnp.transpose(pos_col)                                            # (8, NP)

    eterm_t = _eterm_table(invbox, vol)

    out = pl.pallas_call(
        _pme_kernel,
        out_shape=jax.ShapeDtypeStruct((16, 128), jnp.float32),
        grid=(2,),
        in_specs=[
            pl.BlockSpec((8, NP_ATOMS), lambda i: (0, 0)),
            pl.BlockSpec((NP_ATOMS, 8), lambda i: (0, 0)),
            pl.BlockSpec(memory_space=pltpu.MemorySpace.SMEM),
            pl.BlockSpec((6, NK), lambda i: (0, 0)),
            pl.BlockSpec((NK, 2 * NK), lambda i: (0, 0)),
            pl.BlockSpec((GRIDX, NKXY), lambda i: (0, 0)),
            pl.BlockSpec((GRIDY, NKXY), lambda i: (0, 0)),
            pl.BlockSpec((GRIDZ, NKXY), lambda i: (0, 0)),
        ],
        out_specs=pl.BlockSpec((8, 128), lambda i: (i, 0)),
        compiler_params=pltpu.CompilerParams(dimension_semantics=("parallel",)),
    )(pos_row, pos_col, box,
      jnp.asarray(_AXTAB), jnp.asarray(_DFT_BLK),
      jnp.asarray(_E1), jnp.asarray(_E2), eterm_t)

    # phase 0 block holds edir, phase 1 block holds erecip
    return out[0, 0] + out[8, 0]


if __name__ == "__main__":
    key = jax.random.PRNGKey(0)
    kp, kq = jax.random.split(key)

    # reduced-form (slightly triclinic) periodic box, > 2*cutoff in every direction
    box_vectors = jnp.asarray([[1.10, 0.00, 0.00],
                               [0.05, 1.20, 0.00],
                               [-0.03, 0.07, 1.30]], jnp.float32)
    frac = jax.random.uniform(kp, (NATOMS, 3), jnp.float32)
    positions = frac @ box_vectors                       # (9, 3) inside the box
    charges = jax.random.normal(kq, (NATOMS,), jnp.float32)
    charges = charges - jnp.mean(charges)                # neutral system

    energy = pme_forward(positions, charges, box_vectors)
    jax.block_until_ready(energy)
    print("KERNEL_OK")
</pallas_src>

<mosaic_0001>
module attributes {stable_mosaic.version = 11 : i64} {
  func.func @_pme_kernel(%arg0: i32, %arg1: memref<8x16xf32, #tpu.memory_space<vmem>>, %arg2: memref<16x8xf32, #tpu.memory_space<vmem>>, %arg3: memref<3x3xf32, #tpu.memory_space<smem>>, %arg4: memref<6x45xf32, #tpu.memory_space<vmem>>, %arg5: memref<45x90xf32, #tpu.memory_space<vmem>>, %arg6: memref<14x210xf32, #tpu.memory_space<vmem>>, %arg7: memref<15x210xf32, #tpu.memory_space<vmem>>, %arg8: memref<16x210xf32, #tpu.memory_space<vmem>>, %arg9: memref<8x128xf32, #tpu.memory_space<vmem>>) attributes {dimension_semantics = [#tpu.dimension_semantics<parallel>], iteration_bounds = array<i64: 2>, scalar_prefetch = 0 : i64, scratch_operands = 0 : i64, tpu.core_type = #tpu.core_type<tc>, window_params = [{pipeline_mode = #tpu.pipeline_mode<synchronous>, transform_indices = @transform_0, window_bounds = array<i64: 8, 16>}, {pipeline_mode = #tpu.pipeline_mode<synchronous>, transform_indices = @transform_1, window_bounds = array<i64: 16, 8>}, {transform_indices = @transform_2, window_bounds = array<i64: 3, 3>}, {pipeline_mode = #tpu.pipeline_mode<synchronous>, transform_indices = @transform_3, window_bounds = array<i64: 6, 45>}, {pipeline_mode = #tpu.pipeline_mode<synchronous>, transform_indices = @transform_4, window_bounds = array<i64: 45, 90>}, {pipeline_mode = #tpu.pipeline_mode<synchronous>, transform_indices = @transform_5, window_bounds = array<i64: 14, 210>}, {pipeline_mode = #tpu.pipeline_mode<synchronous>, transform_indices = @transform_6, window_bounds = array<i64: 15, 210>}, {pipeline_mode = #tpu.pipeline_mode<synchronous>, transform_indices = @transform_7, window_bounds = array<i64: 16, 210>}, {transform_indices = @transform_8, window_bounds = array<i64: 8, 128>}]} {
    %c0_i32 = arith.constant 0 : i32
    %0 = arith.cmpi eq, %arg0, %c0_i32 : i32
    %1 = arith.extui %0 : i1 to i32
    %c0_i32_0 = arith.constant 0 : i32
    %2 = arith.cmpi ne, %1, %c0_i32_0 : i32
    scf.if %2 {
      %c0 = arith.constant 0 : index
      %c0_2 = arith.constant 0 : index
      %6 = vector.load %arg1[%c0, %c0_2] : memref<8x16xf32, #tpu.memory_space<vmem>>, vector<1x16xf32>
      %c1 = arith.constant 1 : index
      %c0_3 = arith.constant 0 : index
      %7 = vector.load %arg1[%c1, %c0_3] : memref<8x16xf32, #tpu.memory_space<vmem>>, vector<1x16xf32>
      %c2 = arith.constant 2 : index
      %c0_4 = arith.constant 0 : index
      %8 = vector.load %arg1[%c2, %c0_4] : memref<8x16xf32, #tpu.memory_space<vmem>>, vector<1x16xf32>
      %c0_5 = arith.constant 0 : index
      %c0_6 = arith.constant 0 : index
      %9 = vector.load %arg2[%c0_5, %c0_6] : memref<16x8xf32, #tpu.memory_space<vmem>>, vector<16x1xf32>
      %10 = vector.broadcast %9 : vector<16x1xf32> to vector<16x16xf32>
      %11 = vector.broadcast %6 : vector<1x16xf32> to vector<16x16xf32>
      %12 = arith.subf %10, %11 : vector<16x16xf32>
      %c0_7 = arith.constant 0 : index
      %c1_8 = arith.constant 1 : index
      %13 = vector.load %arg2[%c0_7, %c1_8] : memref<16x8xf32, #tpu.memory_space<vmem>>, vector<16x1xf32>
      %14 = vector.broadcast %13 : vector<16x1xf32> to vector<16x16xf32>
      %15 = vector.broadcast %7 : vector<1x16xf32> to vector<16x16xf32>
      %16 = arith.subf %14, %15 : vector<16x16xf32>
      %c0_9 = arith.constant 0 : index
      %c2_10 = arith.constant 2 : index
      %17 = vector.load %arg2[%c0_9, %c2_10] : memref<16x8xf32, #tpu.memory_space<vmem>>, vector<16x1xf32>
      %18 = vector.broadcast %17 : vector<16x1xf32> to vector<16x16xf32>
      %19 = vector.broadcast %8 : vector<1x16xf32> to vector<16x16xf32>
      %20 = arith.subf %18, %19 : vector<16x16xf32>
      %c0_11 = arith.constant 0 : index
      %c0_12 = arith.constant 0 : index
      %21 = memref.load %arg3[%c0_11, %c0_12] : memref<3x3xf32, #tpu.memory_space<smem>>
      %c1_13 = arith.constant 1 : index
      %c0_14 = arith.constant 0 : index
      %22 = memref.load %arg3[%c1_13, %c0_14] : memref<3x3xf32, #tpu.memory_space<smem>>
      %c1_15 = arith.constant 1 : index
      %c1_16 = arith.constant 1 : index
      %23 = memref.load %arg3[%c1_15, %c1_16] : memref<3x3xf32, #tpu.memory_space<smem>>
      %c2_17 = arith.constant 2 : index
      %c0_18 = arith.constant 0 : index
      %24 = memref.load %arg3[%c2_17, %c0_18] : memref<3x3xf32, #tpu.memory_space<smem>>
      %c2_19 = arith.constant 2 : index
      %c1_20 = arith.constant 1 : index
      %25 = memref.load %arg3[%c2_19, %c1_20] : memref<3x3xf32, #tpu.memory_space<smem>>
      %c2_21 = arith.constant 2 : index
      %c2_22 = arith.constant 2 : index
      %26 = memref.load %arg3[%c2_21, %c2_22] : memref<3x3xf32, #tpu.memory_space<smem>>
      %27 = vector.broadcast %26 : f32 to vector<16x16xf32>
      %28 = arith.divf %20, %27 : vector<16x16xf32>
      %cst = arith.constant 5.000000e-01 : f32
      %29 = vector.broadcast %cst : f32 to vector<16x16xf32>
      %30 = arith.addf %28, %29 : vector<16x16xf32>
      %31 = math.floor %30 : vector<16x16xf32>
      %32 = vector.broadcast %24 : f32 to vector<16x16xf32>
      %33 = arith.mulf %31, %32 : vector<16x16xf32>
      %34 = arith.subf %12, %33 : vector<16x16xf32>
      %35 = vector.broadcast %25 : f32 to vector<16x16xf32>
      %36 = arith.mulf %31, %35 : vector<16x16xf32>
      %37 = arith.subf %16, %36 : vector<16x16xf32>
      %38 = vector.broadcast %26 : f32 to vector<16x16xf32>
      %39 = arith.mulf %31, %38 : vector<16x16xf32>
      %40 = arith.subf %20, %39 : vector<16x16xf32>
      %41 = vector.broadcast %23 : f32 to vector<16x16xf32>
      %42 = arith.divf %37, %41 : vector<16x16xf32>
      %cst_23 = arith.constant 5.000000e-01 : f32
      %43 = vector.broadcast %cst_23 : f32 to vector<16x16xf32>
      %44 = arith.addf %42, %43 : vector<16x16xf32>
      %45 = math.floor %44 : vector<16x16xf32>
      %46 = vector.broadcast %22 : f32 to vector<16x16xf32>
      %47 = arith.mulf %45, %46 : vector<16x16xf32>
      %48 = arith.subf %34, %47 : vector<16x16xf32>
      %49 = vector.broadcast %23 : f32 to vector<16x16xf32>
      %50 = arith.mulf %45, %49 : vector<16x16xf32>
      %51 = arith.subf %37, %50 : vector<16x16xf32>
      %52 = vector.broadcast %21 : f32 to vector<16x16xf32>
      %53 = arith.divf %48, %52 : vector<16x16xf32>
      %cst_24 = arith.constant 5.000000e-01 : f32
      %54 = vector.broadcast %cst_24 : f32 to vector<16x16xf32>
      %55 = arith.addf %53, %54 : vector<16x16xf32>
      %56 = math.floor %55 : vector<16x16xf32>
      %57 = vector.broadcast %21 : f32 to vector<16x16xf32>
      %58 = arith.mulf %56, %57 : vector<16x16xf32>
      %59 = arith.subf %48, %58 : vector<16x16xf32>
      %60 = arith.mulf %59, %59 : vector<16x16xf32>
      %61 = arith.mulf %51, %51 : vector<16x16xf32>
      %62 = arith.addf %60, %61 : vector<16x16xf32>
      %63 = arith.mulf %40, %40 : vector<16x16xf32>
      %64 = arith.addf %62, %63 : vector<16x16xf32>
      %c0_25 = arith.constant 0 : index
      %c3 = arith.constant 3 : index
      %65 = vector.load %arg2[%c0_25, %c3] : memref<16x8xf32, #tpu.memory_space<vmem>>, vector<16x1xf32>
      %c3_26 = arith.constant 3 : index
      %c0_27 = arith.constant 0 : index
      %66 = vector.load %arg1[%c3_26, %c0_27] : memref<8x16xf32, #tpu.memory_space<vmem>>, vector<1x16xf32>
      %67 = vector.broadcast %65 : vector<16x1xf32> to vector<16x16xf32>
      %68 = vector.broadcast %66 : vector<1x16xf32> to vector<16x16xf32>
      %69 = arith.mulf %67, %68 : vector<16x16xf32>
      %c0_28 = arith.constant 0 : index
      %c4 = arith.constant 4 : index
      %70 = vector.load %arg2[%c0_28, %c4] : memref<16x8xf32, #tpu.memory_space<vmem>>, vector<16x1xf32>
      %c4_29 = arith.constant 4 : index
      %c0_30 = arith.constant 0 : index
      %71 = vector.load %arg1[%c4_29, %c0_30] : memref<8x16xf32, #tpu.memory_space<vmem>>, vector<1x16xf32>
      %72 = vector.broadcast %70 : vector<16x1xf32> to vector<16x16xf32>
      %73 = vector.broadcast %71 : vector<1x16xf32> to vector<16x16xf32>
      %74 = arith.mulf %72, %73 : vector<16x16xf32>
      %75 = tpu.iota {dimensions = array<i32: 0>} : vector<16x16xi32>
      %76 = tpu.iota {dimensions = array<i32: 1>} : vector<16x16xi32>
      %cst_31 = arith.constant 5.000000e-01 : f32
      %77 = vector.broadcast %cst_31 : f32 to vector<16x16xf32>
      %78 = arith.cmpf ogt, %74, %77 : vector<16x16xf32>
      %79 = arith.cmpi ne, %75, %76 : vector<16x16xi32>
      %80 = arith.andi %78, %79 : vector<16x16xi1>
      %cst_32 = arith.constant 2.500000e-01 : f32
      %81 = vector.broadcast %cst_32 : f32 to vector<16x16xf32>
      %82 = arith.cmpf olt, %64, %81 : vector<16x16xf32>
      %83 = arith.andi %80, %82 : vector<16x16xi1>
      %cst_33 = arith.constant 1.000000e+00 : f32
      %84 = vector.broadcast %cst_33 : f32 to vector<16x16xf32>
      %85 = arith.select %83, %64, %84 : vector<16x16xi1>, vector<16x16xf32>
      %86 = math.sqrt %85 : vector<16x16xf32>
      %cst_34 = arith.constant 4.98582315 : f32
      %87 = vector.broadcast %cst_34 : f32 to vector<16x16xf32>
      %88 = arith.mulf %87, %86 : vector<16x16xf32>
      %cst_35 = arith.constant 0.327591091 : f32
      %89 = vector.broadcast %cst_35 : f32 to vector<16x16xf32>
      %90 = arith.mulf %89, %88 : vector<16x16xf32>
      %cst_36 = arith.constant 1.000000e+00 : f32
      %91 = vector.broadcast %cst_36 : f32 to vector<16x16xf32>
      %92 = arith.addf %91, %90 : vector<16x16xf32>
      %cst_37 = arith.constant 1.000000e+00 : f32
      %93 = vector.broadcast %cst_37 : f32 to vector<16x16xf32>
      %94 = arith.divf %93, %92 : vector<16x16xf32>
      %cst_38 = arith.constant 1.06140542 : f32
      %95 = vector.broadcast %cst_38 : f32 to vector<16x16xf32>
      %96 = arith.mulf %94, %95 : vector<16x16xf32>
      %cst_39 = arith.constant -1.45315206 : f32
      %97 = vector.broadcast %cst_39 : f32 to vector<16x16xf32>
      %98 = arith.addf %97, %96 : vector<16x16xf32>
      %99 = arith.mulf %94, %98 : vector<16x16xf32>
      %cst_40 = arith.constant 1.42141378 : f32
      %100 = vector.broadcast %cst_40 : f32 to vector<16x16xf32>
      %101 = arith.addf %100, %99 : vector<16x16xf32>
      %102 = arith.mulf %94, %101 : vector<16x16xf32>
      %cst_41 = arith.constant -0.284496725 : f32
      %103 = vector.broadcast %cst_41 : f32 to vector<16x16xf32>
      %104 = arith.addf %103, %102 : vector<16x16xf32>
      %105 = arith.mulf %94, %104 : vector<16x16xf32>
      %cst_42 = arith.constant 0.254829586 : f32
      %106 = vector.broadcast %cst_42 : f32 to vector<16x16xf32>
      %107 = arith.addf %106, %105 : vector<16x16xf32>
      %108 = arith.mulf %94, %107 : vector<16x16xf32>
      %cst_43 = arith.constant 0.000000e+00 : f32
      %109 = vector.broadcast %cst_43 : f32 to vector<16x16xf32>
      %110 = arith.subf %109, %88 : vector<16x16xf32>
      %111 = arith.mulf %110, %88 : vector<16x16xf32>
      %112 = math.exp %111 : vector<16x16xf32>
      %113 = arith.mulf %108, %112 : vector<16x16xf32>
      %114 = arith.mulf %69, %113 : vector<16x16xf32>
      %115 = arith.divf %114, %86 : vector<16x16xf32>
      %cst_44 = arith.constant 0.000000e+00 : f32
      %116 = vector.broadcast %cst_44 : f32 to vector<16x16xf32>
      %117 = arith.select %83, %115, %116 : vector<16x16xi1>, vector<16x16xf32>
      %118 = vector.shape_cast %117 : vector<16x16xf32> to vector<1x16x16xf32>
      %cst_45 = arith.constant dense<0.000000e+00> : vector<1xf32>
      %119 = vector.multi_reduction <add>, %118, %cst_45 [1, 2] : vector<1x16x16xf32> to vector<1xf32>
      %120 = vector.shape_cast %119 : vector<1xf32> to vector<1x1x1xf32>
      %121 = vector.extract %120[0, 0, 0] : f32 from vector<1x1x1xf32>
      %cst_46 = arith.constant 6.946750e+01 : f32
      %122 = arith.mulf %cst_46, %121 : f32
      %123 = vector.broadcast %122 : f32 to vector<8x128xf32>
      %c0_47 = arith.constant 0 : index
      %c0_48 = arith.constant 0 : index
      %124 = vector.load %arg9[%c0_47, %c0_48] : memref<8x128xf32, #tpu.memory_space<vmem>>, vector<8x128xf32>
      tpu.vector_store %arg9[%c0_47, %c0_48], %123 {strides = array<i32>} : memref<8x128xf32, #tpu.memory_space<vmem>>, vector<8x128xf32>,
    } else {
    }
    %c1_i32 = arith.constant 1 : i32
    %3 = arith.cmpi eq, %arg0, %c1_i32 : i32
    %4 = arith.extui %3 : i1 to i32
    %c0_i32_1 = arith.constant 0 : i32
    %5 = arith.cmpi ne, %4, %c0_i32_1 : i32
    scf.if %5 {
      %c0 = arith.constant 0 : index
      %c3 = arith.constant 3 : index
      %6 = vector.load %arg2[%c0, %c3] : memref<16x8xf32, #tpu.memory_space<vmem>>, vector<16x1xf32>
      %c0_2 = arith.constant 0 : index
      %c5 = arith.constant 5 : index
      %7 = vector.load %arg2[%c0_2, %c5] : memref<16x8xf32, #tpu.memory_space<vmem>>, vector<16x1xf32>
      %c0_3 = arith.constant 0 : index
      %c6 = arith.constant 6 : index
      %8 = vector.load %arg2[%c0_3, %c6] : memref<16x8xf32, #tpu.memory_space<vmem>>, vector<16x1xf32>
      %c0_4 = arith.constant 0 : index
      %c7 = arith.constant 7 : index
      %9 = vector.load %arg2[%c0_4, %c7] : memref<16x8xf32, #tpu.memory_space<vmem>>, vector<16x1xf32>
      %c0_5 = arith.constant 0 : index
      %c0_6 = arith.constant 0 : index
      %10 = vector.load %arg4[%c0_5, %c0_6] : memref<6x45xf32, #tpu.memory_space<vmem>>, vector<1x45xf32>
      %c1 = arith.constant 1 : index
      %c0_7 = arith.constant 0 : index
      %11 = vector.load %arg4[%c1, %c0_7] : memref<6x45xf32, #tpu.memory_space<vmem>>, vector<1x45xf32>
      %c2 = arith.constant 2 : index
      %c0_8 = arith.constant 0 : index
      %12 = vector.load %arg4[%c2, %c0_8] : memref<6x45xf32, #tpu.memory_space<vmem>>, vector<1x45xf32>
      %c3_9 = arith.constant 3 : index
      %c0_10 = arith.constant 0 : index
      %13 = vector.load %arg4[%c3_9, %c0_10] : memref<6x45xf32, #tpu.memory_space<vmem>>, vector<1x45xf32>
      %c4 = arith.constant 4 : index
      %c0_11 = arith.constant 0 : index
      %14 = vector.load %arg4[%c4, %c0_11] : memref<6x45xf32, #tpu.memory_space<vmem>>, vector<1x45xf32>
      %c5_12 = arith.constant 5 : index
      %c0_13 = arith.constant 0 : index
      %15 = vector.load %arg4[%c5_12, %c0_13] : memref<6x45xf32, #tpu.memory_space<vmem>>, vector<1x45xf32>
      %16 = vector.broadcast %7 : vector<16x1xf32> to vector<16x45xf32>
      %17 = vector.broadcast %13 : vector<1x45xf32> to vector<16x45xf32>
      %18 = arith.mulf %16, %17 : vector<16x45xf32>
      %19 = vector.broadcast %8 : vector<16x1xf32> to vector<16x45xf32>
      %20 = vector.broadcast %14 : vector<1x45xf32> to vector<16x45xf32>
      %21 = arith.mulf %19, %20 : vector<16x45xf32>
      %22 = arith.addf %18, %21 : vector<16x45xf32>
      %23 = vector.broadcast %9 : vector<16x1xf32> to vector<16x45xf32>
      %24 = vector.broadcast %15 : vector<1x45xf32> to vector<16x45xf32>
      %25 = arith.mulf %23, %24 : vector<16x45xf32>
      %26 = arith.addf %22, %25 : vector<16x45xf32>
      %27 = vector.broadcast %10 : vector<1x45xf32> to vector<16x45xf32>
      %28 = arith.subf %26, %27 : vector<16x45xf32>
      %29 = vector.broadcast %12 : vector<1x45xf32> to vector<16x45xf32>
      %30 = arith.mulf %28, %29 : vector<16x45xf32>
      %31 = math.floor %30 : vector<16x45xf32>
      %32 = vector.broadcast %11 : vector<1x45xf32> to vector<16x45xf32>
      %33 = arith.mulf %31, %32 : vector<16x45xf32>
      %34 = arith.subf %28, %33 : vector<16x45xf32>
      %cst = arith.constant 0.000000e+00 : f32
      %35 = vector.broadcast %cst : f32 to vector<16x45xf32>
      %36 = arith.cmpf ogt, %34, %35 : vector<16x45xf32>
      %cst_14 = arith.constant 2.000000e+00 : f32
      %37 = vector.broadcast %cst_14 : f32 to vector<16x45xf32>
      %38 = arith.cmpf olt, %34, %37 : vector<16x45xf32>
      %39 = arith.andi %36, %38 : vector<16x45xi1>
      %cst_15 = arith.constant 1.000000e+00 : f32
      %40 = vector.broadcast %cst_15 : f32 to vector<16x45xf32>
      %41 = arith.subf %34, %40 : vector<16x45xf32>
      %42 = math.absf %41 : vector<16x45xf32>
      %cst_16 = arith.constant 1.000000e+00 : f32
      %43 = vector.broadcast %cst_16 : f32 to vector<16x45xf32>
      %44 = arith.subf %43, %42 : vector<16x45xf32>
      %cst_17 = arith.constant 0.000000e+00 : f32
      %45 = vector.broadcast %cst_17 : f32 to vector<16x45xf32>
      %46 = arith.select %39, %44, %45 : vector<16x45xi1>, vector<16x45xf32>
      %47 = arith.mulf %34, %46 : vector<16x45xf32>
      %cst_18 = arith.constant 3.000000e+00 : f32
      %48 = vector.broadcast %cst_18 : f32 to vector<16x45xf32>
      %49 = arith.subf %48, %34 : vector<16x45xf32>
      %cst_19 = arith.constant 1.000000e+00 : f32
      %50 = vector.broadcast %cst_19 : f32 to vector<16x45xf32>
      %51 = arith.subf %34, %50 : vector<16x45xf32>
      %cst_20 = arith.constant 0.000000e+00 : f32
      %52 = vector.broadcast %cst_20 : f32 to vector<16x45xf32>
      %53 = arith.cmpf ogt, %51, %52 : vector<16x45xf32>
      %cst_21 = arith.constant 2.000000e+00 : f32
      %54 = vector.broadcast %cst_21 : f32 to vector<16x45xf32>
      %55 = arith.cmpf olt, %51, %54 : vector<16x45xf32>
      %56 = arith.andi %53, %55 : vector<16x45xi1>
      %cst_22 = arith.constant 1.000000e+00 : f32
      %57 = vector.broadcast %cst_22 : f32 to vector<16x45xf32>
      %58 = arith.subf %51, %57 : vector<16x45xf32>
      %59 = math.absf %58 : vector<16x45xf32>
      %cst_23 = arith.constant 1.000000e+00 : f32
      %60 = vector.broadcast %cst_23 : f32 to vector<16x45xf32>
      %61 = arith.subf %60, %59 : vector<16x45xf32>
      %cst_24 = arith.constant 0.000000e+00 : f32
      %62 = vector.broadcast %cst_24 : f32 to vector<16x45xf32>
      %63 = arith.select %56, %61, %62 : vector<16x45xi1>, vector<16x45xf32>
      %64 = arith.mulf %49, %63 : vector<16x45xf32>
      %65 = arith.addf %47, %64 : vector<16x45xf32>
      %cst_25 = arith.constant 2.000000e+00 : f32
      %66 = vector.broadcast %cst_25 : f32 to vector<16x45xf32>
      %67 = arith.divf %65, %66 : vector<16x45xf32>
      %68 = arith.mulf %34, %67 : vector<16x45xf32>
      %cst_26 = arith.constant 4.000000e+00 : f32
      %69 = vector.broadcast %cst_26 : f32 to vector<16x45xf32>
      %70 = arith.subf %69, %34 : vector<16x45xf32>
      %cst_27 = arith.constant 1.000000e+00 : f32
      %71 = vector.broadcast %cst_27 : f32 to vector<16x45xf32>
      %72 = arith.subf %34, %71 : vector<16x45xf32>
      %cst_28 = arith.constant 0.000000e+00 : f32
      %73 = vector.broadcast %cst_28 : f32 to vector<16x45xf32>
      %74 = arith.cmpf ogt, %72, %73 : vector<16x45xf32>
      %cst_29 = arith.constant 2.000000e+00 : f32
      %75 = vector.broadcast %cst_29 : f32 to vector<16x45xf32>
      %76 = arith.cmpf olt, %72, %75 : vector<16x45xf32>
      %77 = arith.andi %74, %76 : vector<16x45xi1>
      %cst_30 = arith.constant 1.000000e+00 : f32
      %78 = vector.broadcast %cst_30 : f32 to vector<16x45xf32>
      %79 = arith.subf %72, %78 : vector<16x45xf32>
      %80 = math.absf %79 : vector<16x45xf32>
      %cst_31 = arith.constant 1.000000e+00 : f32
      %81 = vector.broadcast %cst_31 : f32 to vector<16x45xf32>
      %82 = arith.subf %81, %80 : vector<16x45xf32>
      %cst_32 = arith.constant 0.000000e+00 : f32
      %83 = vector.broadcast %cst_32 : f32 to vector<16x45xf32>
      %84 = arith.select %77, %82, %83 : vector<16x45xi1>, vector<16x45xf32>
      %85 = arith.mulf %72, %84 : vector<16x45xf32>
      %cst_33 = arith.constant 3.000000e+00 : f32
      %86 = vector.broadcast %cst_33 : f32 to vector<16x45xf32>
      %87 = arith.subf %86, %72 : vector<16x45xf32>
      %cst_34 = arith.constant 1.000000e+00 : f32
      %88 = vector.broadcast %cst_34 : f32 to vector<16x45xf32>
      %89 = arith.subf %72, %88 : vector<16x45xf32>
      %cst_35 = arith.constant 0.000000e+00 : f32
      %90 = vector.broadcast %cst_35 : f32 to vector<16x45xf32>
      %91 = arith.cmpf ogt, %89, %90 : vector<16x45xf32>
      %cst_36 = arith.constant 2.000000e+00 : f32
      %92 = vector.broadcast %cst_36 : f32 to vector<16x45xf32>
      %93 = arith.cmpf olt, %89, %92 : vector<16x45xf32>
      %94 = arith.andi %91, %93 : vector<16x45xi1>
      %cst_37 = arith.constant 1.000000e+00 : f32
      %95 = vector.broadcast %cst_37 : f32 to vector<16x45xf32>
      %96 = arith.subf %89, %95 : vector<16x45xf32>
      %97 = math.absf %96 : vector<16x45xf32>
      %cst_38 = arith.constant 1.000000e+00 : f32
      %98 = vector.broadcast %cst_38 : f32 to vector<16x45xf32>
      %99 = arith.subf %98, %97 : vector<16x45xf32>
      %cst_39 = arith.constant 0.000000e+00 : f32
      %100 = vector.broadcast %cst_39 : f32 to vector<16x45xf32>
      %101 = arith.select %94, %99, %100 : vector<16x45xi1>, vector<16x45xf32>
      %102 = arith.mulf %87, %101 : vector<16x45xf32>
      %103 = arith.addf %85, %102 : vector<16x45xf32>
      %cst_40 = arith.constant 2.000000e+00 : f32
      %104 = vector.broadcast %cst_40 : f32 to vector<16x45xf32>
      %105 = arith.divf %103, %104 : vector<16x45xf32>
      %106 = arith.mulf %70, %105 : vector<16x45xf32>
      %107 = arith.addf %68, %106 : vector<16x45xf32>
      %cst_41 = arith.constant 3.000000e+00 : f32
      %108 = vector.broadcast %cst_41 : f32 to vector<16x45xf32>
      %109 = arith.divf %107, %108 : vector<16x45xf32>
      %110 = arith.mulf %34, %109 : vector<16x45xf32>
      %cst_42 = arith.constant 5.000000e+00 : f32
      %111 = vector.broadcast %cst_42 : f32 to vector<16x45xf32>
      %112 = arith.subf %111, %34 : vector<16x45xf32>
      %cst_43 = arith.constant 1.000000e+00 : f32
      %113 = vector.broadcast %cst_43 : f32 to vector<16x45xf32>
      %114 = arith.subf %34, %113 : vector<16x45xf32>
      %cst_44 = arith.constant 0.000000e+00 : f32
      %115 = vector.broadcast %cst_44 : f32 to vector<16x45xf32>
      %116 = arith.cmpf ogt, %114, %115 : vector<16x45xf32>
      %cst_45 = arith.constant 2.000000e+00 : f32
      %117 = vector.broadcast %cst_45 : f32 to vector<16x45xf32>
      %118 = arith.cmpf olt, %114, %117 : vector<16x45xf32>
      %119 = arith.andi %116, %118 : vector<16x45xi1>
      %cst_46 = arith.constant 1.000000e+00 : f32
      %120 = vector.broadcast %cst_46 : f32 to vector<16x45xf32>
      %121 = arith.subf %114, %120 : vector<16x45xf32>
      %122 = math.absf %121 : vector<16x45xf32>
      %cst_47 = arith.constant 1.000000e+00 : f32
      %123 = vector.broadcast %cst_47 : f32 to vector<16x45xf32>
      %124 = arith.subf %123, %122 : vector<16x45xf32>
      %cst_48 = arith.constant 0.000000e+00 : f32
      %125 = vector.broadcast %cst_48 : f32 to vector<16x45xf32>
      %126 = arith.select %119, %124, %125 : vector<16x45xi1>, vector<16x45xf32>
      %127 = arith.mulf %114, %126 : vector<16x45xf32>
      %cst_49 = arith.constant 3.000000e+00 : f32
      %128 = vector.broadcast %cst_49 : f32 to vector<16x45xf32>
      %129 = arith.subf %128, %114 : vector<16x45xf32>
      %cst_50 = arith.constant 1.000000e+00 : f32
      %130 = vector.broadcast %cst_50 : f32 to vector<16x45xf32>
      %131 = arith.subf %114, %130 : vector<16x45xf32>
      %cst_51 = arith.constant 0.000000e+00 : f32
      %132 = vector.broadcast %cst_51 : f32 to vector<16x45xf32>
      %133 = arith.cmpf ogt, %131, %132 : vector<16x45xf32>
      %cst_52 = arith.constant 2.000000e+00 : f32
      %134 = vector.broadcast %cst_52 : f32 to vector<16x45xf32>
      %135 = arith.cmpf olt, %131, %134 : vector<16x45xf32>
      %136 = arith.andi %133, %135 : vector<16x45xi1>
      %cst_53 = arith.constant 1.000000e+00 : f32
      %137 = vector.broadcast %cst_53 : f32 to vector<16x45xf32>
      %138 = arith.subf %131, %137 : vector<16x45xf32>
      %139 = math.absf %138 : vector<16x45xf32>
      %cst_54 = arith.constant 1.000000e+00 : f32
      %140 = vector.broadcast %cst_54 : f32 to vector<16x45xf32>
      %141 = arith.subf %140, %139 : vector<16x45xf32>
      %cst_55 = arith.constant 0.000000e+00 : f32
      %142 = vector.broadcast %cst_55 : f32 to vector<16x45xf32>
      %143 = arith.select %136, %141, %142 : vector<16x45xi1>, vector<16x45xf32>
      %144 = arith.mulf %129, %143 : vector<16x45xf32>
      %145 = arith.addf %127, %144 : vector<16x45xf32>
      %cst_56 = arith.constant 2.000000e+00 : f32
      %146 = vector.broadcast %cst_56 : f32 to vector<16x45xf32>
      %147 = arith.divf %145, %146 : vector<16x45xf32>
      %148 = arith.mulf %114, %147 : vector<16x45xf32>
      %cst_57 = arith.constant 4.000000e+00 : f32
      %149 = vector.broadcast %cst_57 : f32 to vector<16x45xf32>
      %150 = arith.subf %149, %114 : vector<16x45xf32>
      %cst_58 = arith.constant 1.000000e+00 : f32
      %151 = vector.broadcast %cst_58 : f32 to vector<16x45xf32>
      %152 = arith.subf %114, %151 : vector<16x45xf32>
      %cst_59 = arith.constant 0.000000e+00 : f32
      %153 = vector.broadcast %cst_59 : f32 to vector<16x45xf32>
      %154 = arith.cmpf ogt, %152, %153 : vector<16x45xf32>
      %cst_60 = arith.constant 2.000000e+00 : f32
      %155 = vector.broadcast %cst_60 : f32 to vector<16x45xf32>
      %156 = arith.cmpf olt, %152, %155 : vector<16x45xf32>
      %157 = arith.andi %154, %156 : vector<16x45xi1>
      %cst_61 = arith.constant 1.000000e+00 : f32
      %158 = vector.broadcast %cst_61 : f32 to vector<16x45xf32>
      %159 = arith.subf %152, %158 : vector<16x45xf32>
      %160 = math.absf %159 : vector<16x45xf32>
      %cst_62 = arith.constant 1.000000e+00 : f32
      %161 = vector.broadcast %cst_62 : f32 to vector<16x45xf32>
      %162 = arith.subf %161, %160 : vector<16x45xf32>
      %cst_63 = arith.constant 0.000000e+00 : f32
      %163 = vector.broadcast %cst_63 : f32 to vector<16x45xf32>
      %164 = arith.select %157, %162, %163 : vector<16x45xi1>, vector<16x45xf32>
      %165 = arith.mulf %152, %164 : vector<16x45xf32>
      %cst_64 = arith.constant 3.000000e+00 : f32
      %166 = vector.broadcast %cst_64 : f32 to vector<16x45xf32>
      %167 = arith.subf %166, %152 : vector<16x45xf32>
      %cst_65 = arith.constant 1.000000e+00 : f32
      %168 = vector.broadcast %cst_65 : f32 to vector<16x45xf32>
      %169 = arith.subf %152, %168 : vector<16x45xf32>
      %cst_66 = arith.constant 0.000000e+00 : f32
      %170 = vector.broadcast %cst_66 : f32 to vector<16x45xf32>
      %171 = arith.cmpf ogt, %169, %170 : vector<16x45xf32>
      %cst_67 = arith.constant 2.000000e+00 : f32
      %172 = vector.broadcast %cst_67 : f32 to vector<16x45xf32>
      %173 = arith.cmpf olt, %169, %172 : vector<16x45xf32>
      %174 = arith.andi %171, %173 : vector<16x45xi1>
      %cst_68 = arith.constant 1.000000e+00 : f32
      %175 = vector.broadcast %cst_68 : f32 to vector<16x45xf32>
      %176 = arith.subf %169, %175 : vector<16x45xf32>
      %177 = math.absf %176 : vector<16x45xf32>
      %cst_69 = arith.constant 1.000000e+00 : f32
      %178 = vector.broadcast %cst_69 : f32 to vector<16x45xf32>
      %179 = arith.subf %178, %177 : vector<16x45xf32>
      %cst_70 = arith.constant 0.000000e+00 : f32
      %180 = vector.broadcast %cst_70 : f32 to vector<16x45xf32>
      %181 = arith.select %174, %179, %180 : vector<16x45xi1>, vector<16x45xf32>
      %182 = arith.mulf %167, %181 : vector<16x45xf32>
      %183 = arith.addf %165, %182 : vector<16x45xf32>
      %cst_71 = arith.constant 2.000000e+00 : f32
      %184 = vector.broadcast %cst_71 : f32 to vector<16x45xf32>
      %185 = arith.divf %183, %184 : vector<16x45xf32>
      %186 = arith.mulf %150, %185 : vector<16x45xf32>
      %187 = arith.addf %148, %186 : vector<16x45xf32>
      %cst_72 = arith.constant 3.000000e+00 : f32
      %188 = vector.broadcast %cst_72 : f32 to vector<16x45xf32>
      %189 = arith.divf %187, %188 : vector<16x45xf32>
      %190 = arith.mulf %112, %189 : vector<16x45xf32>
      %191 = arith.addf %110, %190 : vector<16x45xf32>
      %cst_73 = arith.constant 4.000000e+00 : f32
      %192 = vector.broadcast %cst_73 : f32 to vector<16x45xf32>
      %193 = arith.divf %191, %192 : vector<16x45xf32>
      %c0_74 = arith.constant 0 : index
      %c0_75 = arith.constant 0 : index
      %194 = vector.load %arg5[%c0_74, %c0_75] : memref<45x90xf32, #tpu.memory_space<vmem>>, vector<45x90xf32>
      %cst_76 = arith.constant dense<0.000000e+00> : vector<16x90xf32>
      %195 = tpu.matmul %193, %194, %cst_76 {dimension_numbers = #tpu.dot_dimension_numbers<[1], [0], [0], [1], [0, 0, 1, 1], [], []>} : vector<16x45xf32>, vector<45x90xf32>, vector<16x90xf32> -> vector<16x90xf32>
      %196 = vector.extract_strided_slice %195 {offsets = [0, 0], sizes = [16, 14], strides = [1, 1]} : vector<16x90xf32> to vector<16x14xf32>
      %197 = vector.extract_strided_slice %195 {offsets = [0, 14], sizes = [16, 14], strides = [1, 1]} : vector<16x90xf32> to vector<16x14xf32>
      %198 = vector.extract_strided_slice %195 {offsets = [0, 28], sizes = [16, 15], strides = [1, 1]} : vector<16x90xf32> to vector<16x15xf32>
      %199 = vector.extract_strided_slice %195 {offsets = [0, 43], sizes = [16, 15], strides = [1, 1]} : vector<16x90xf32> to vector<16x15xf32>
      %200 = vector.extract_strided_slice %195 {offsets = [0, 58], sizes = [16, 16], strides = [1, 1]} : vector<16x90xf32> to vector<16x16xf32>
      %201 = vector.extract_strided_slice %195 {offsets = [0, 74], sizes = [16, 16], strides = [1, 1]} : vector<16x90xf32> to vector<16x16xf32>
      %c0_77 = arith.constant 0 : index
      %c0_78 = arith.constant 0 : index
      %202 = vector.load %arg6[%c0_77, %c0_78] : memref<14x210xf32, #tpu.memory_space<vmem>>, vector<14x210xf32>
      %cst_79 = arith.constant dense<0.000000e+00> : vector<16x210xf32>
      %203 = tpu.matmul %196, %202, %cst_79 {dimension_numbers = #tpu.dot_dimension_numbers<[1], [0], [0], [1], [0, 0, 1, 1], [], []>} : vector<16x14xf32>, vector<14x210xf32>, vector<16x210xf32> -> vector<16x210xf32>
      %c0_80 = arith.constant 0 : index
      %c0_81 = arith.constant 0 : index
      %204 = vector.load %arg6[%c0_80, %c0_81] : memref<14x210xf32, #tpu.memory_space<vmem>>, vector<14x210xf32>
      %cst_82 = arith.constant dense<0.000000e+00> : vector<16x210xf32>
      %205 = tpu.matmul %197, %204, %cst_82 {dimension_numbers = #tpu.dot_dimension_numbers<[1], [0], [0], [1], [0, 0, 1, 1], [], []>} : vector<16x14xf32>, vector<14x210xf32>, vector<16x210xf32> -> vector<16x210xf32>
      %c0_83 = arith.constant 0 : index
      %c0_84 = arith.constant 0 : index
      %206 = vector.load %arg7[%c0_83, %c0_84] : memref<15x210xf32, #tpu.memory_space<vmem>>, vector<15x210xf32>
      %cst_85 = arith.constant dense<0.000000e+00> : vector<16x210xf32>
      %207 = tpu.matmul %198, %206, %cst_85 {dimension_numbers = #tpu.dot_dimension_numbers<[1], [0], [0], [1], [0, 0, 1, 1], [], []>} : vector<16x15xf32>, vector<15x210xf32>, vector<16x210xf32> -> vector<16x210xf32>
      %c0_86 = arith.constant 0 : index
      %c0_87 = arith.constant 0 : index
      %208 = vector.load %arg7[%c0_86, %c0_87] : memref<15x210xf32, #tpu.memory_space<vmem>>, vector<15x210xf32>
      %cst_88 = arith.constant dense<0.000000e+00> : vector<16x210xf32>
      %209 = tpu.matmul %199, %208, %cst_88 {dimension_numbers = #tpu.dot_dimension_numbers<[1], [0], [0], [1], [0, 0, 1, 1], [], []>} : vector<16x15xf32>, vector<15x210xf32>, vector<16x210xf32> -> vector<16x210xf32>
      %210 = arith.mulf %203, %207 : vector<16x210xf32>
      %211 = arith.mulf %205, %209 : vector<16x210xf32>
      %212 = arith.subf %210, %211 : vector<16x210xf32>
      %213 = vector.broadcast %6 : vector<16x1xf32> to vector<16x210xf32>
      %214 = arith.mulf %213, %212 : vector<16x210xf32>
      %215 = arith.mulf %203, %209 : vector<16x210xf32>
      %216 = arith.mulf %205, %207 : vector<16x210xf32>
      %217 = arith.addf %215, %216 : vector<16x210xf32>
      %218 = vector.broadcast %6 : vector<16x1xf32> to vector<16x210xf32>
      %219 = arith.mulf %218, %217 : vector<16x210xf32>
      %220 = tpu.transpose %200, [1, 0] : vector<16x16xf32> -> vector<16x16xf32>
      %221 = tpu.transpose %201, [1, 0] : vector<16x16xf32> -> vector<16x16xf32>
      %cst_89 = arith.constant dense<0.000000e+00> : vector<16x210xf32>
      %222 = tpu.matmul %220, %214, %cst_89 {dimension_numbers = #tpu.dot_dimension_numbers<[1], [0], [0], [1], [0, 0, 1, 1], [], []>} : vector<16x16xf32>, vector<16x210xf32>, vector<16x210xf32> -> vector<16x210xf32>
      %cst_90 = arith.constant dense<0.000000e+00> : vector<16x210xf32>
      %223 = tpu.matmul %221, %219, %cst_90 {dimension_numbers = #tpu.dot_dimension_numbers<[1], [0], [0], [1], [0, 0, 1, 1], [], []>} : vector<16x16xf32>, vector<16x210xf32>, vector<16x210xf32> -> vector<16x210xf32>
      %224 = arith.subf %222, %223 : vector<16x210xf32>
      %cst_91 = arith.constant dense<0.000000e+00> : vector<16x210xf32>
      %225 = tpu.matmul %221, %214, %cst_91 {dimension_numbers = #tpu.dot_dimension_numbers<[1], [0], [0], [1], [0, 0, 1, 1], [], []>} : vector<16x16xf32>, vector<16x210xf32>, vector<16x210xf32> -> vector<16x210xf32>
      %cst_92 = arith.constant dense<0.000000e+00> : vector<16x210xf32>
      %226 = tpu.matmul %220, %219, %cst_92 {dimension_numbers = #tpu.dot_dimension_numbers<[1], [0], [0], [1], [0, 0, 1, 1], [], []>} : vector<16x16xf32>, vector<16x210xf32>, vector<16x210xf32> -> vector<16x210xf32>
      %227 = arith.addf %225, %226 : vector<16x210xf32>
      %228 = arith.mulf %224, %224 : vector<16x210xf32>
      %229 = arith.mulf %227, %227 : vector<16x210xf32>
      %230 = arith.addf %228, %229 : vector<16x210xf32>
      %c0_93 = arith.constant 0 : index
      %c0_94 = arith.constant 0 : index
      %231 = vector.load %arg8[%c0_93, %c0_94] : memref<16x210xf32, #tpu.memory_space<vmem>>, vector<16x210xf32>
      %232 = arith.mulf %231, %230 : vector<16x210xf32>
      %233 = vector.shape_cast %232 : vector<16x210xf32> to vector<1x16x210xf32>
      %cst_95 = arith.constant dense<0.000000e+00> : vector<1xf32>
      %234 = vector.multi_reduction <add>, %233, %cst_95 [1, 2] : vector<1x16x210xf32> to vector<1xf32>
      %235 = vector.shape_cast %234 : vector<1xf32> to vector<1x1x1xf32>
      %236 = vector.extract %235[0, 0, 0] : f32 from vector<1x1x1xf32>
      %c3_96 = arith.constant 3 : index
      %c0_97 = arith.constant 0 : index
      %237 = vector.load %arg1[%c3_96, %c0_97] : memref<8x16xf32, #tpu.memory_space<vmem>>, vector<1x16xf32>
      %238 = arith.mulf %237, %237 : vector<1x16xf32>
      %239 = vector.shape_cast %238 : vector<1x16xf32> to vector<1x1x16xf32>
      %cst_98 = arith.constant dense<0.000000e+00> : vector<1xf32>
      %240 = vector.multi_reduction <add>, %239, %cst_98 [1, 2] : vector<1x1x16xf32> to vector<1xf32>
      %241 = vector.shape_cast %240 : vector<1xf32> to vector<1x1x1xf32>
      %242 = vector.extract %241[0, 0, 0] : f32 from vector<1x1x1xf32>
      %cst_99 = arith.constant -390.817139 : f32
      %243 = arith.mulf %cst_99, %242 : f32
      %244 = arith.addf %236, %243 : f32
      %245 = vector.broadcast %244 : f32 to vector<8x128xf32>
      %c0_100 = arith.constant 0 : index
      %c0_101 = arith.constant 0 : index
      %246 = vector.load %arg9[%c0_100, %c0_101] : memref<8x128xf32, #tpu.memory_space<vmem>>, vector<8x128xf32>
      tpu.vector_store %arg9[%c0_100, %c0_101], %245 {strides = array<i32>} : memref<8x128xf32, #tpu.memory_space<vmem>>, vector<8x128xf32>,
    } else {
    }
    return
  }
  func.func @transform_0(%arg0: i32) -> (i32, i32) {
    %c0_i32 = arith.constant 0 : i32
    %c0_i32_0 = arith.constant 0 : i32
    %c0_i32_1 = arith.constant 0 : i32
    return %c0_i32, %c0_i32_0 : i32, i32
  }
  func.func @transform_1(%arg0: i32) -> (i32, i32) {
    %c0_i32 = arith.constant 0 : i32
    %c0_i32_0 = arith.constant 0 : i32
    %c0_i32_1 = arith.constant 0 : i32
    return %c0_i32, %c0_i32_0 : i32, i32
  }
  func.func @transform_2(%arg0: i32) -> (i32, i32) {
    %c0_i32 = arith.constant 0 : i32
    %c0_i32_0 = arith.constant 0 : i32
    %c0_i32_1 = arith.constant 0 : i32
    return %c0_i32, %c0_i32_0 : i32, i32
  }
  func.func @transform_3(%arg0: i32) -> (i32, i32) {
    %c0_i32 = arith.constant 0 : i32
    %c0_i32_0 = arith.constant 0 : i32
    %c0_i32_1 = arith.constant 0 : i32
    return %c0_i32, %c0_i32_0 : i32, i32
  }
  func.func @transform_4(%arg0: i32) -> (i32, i32) {
    %c0_i32 = arith.constant 0 : i32
    %c0_i32_0 = arith.constant 0 : i32
    %c0_i32_1 = arith.constant 0 : i32
    return %c0_i32, %c0_i32_0 : i32, i32
  }
  func.func @transform_5(%arg0: i32) -> (i32, i32) {
    %c0_i32 = arith.constant 0 : i32
    %c0_i32_0 = arith.constant 0 : i32
    %c0_i32_1 = arith.constant 0 : i32
    return %c0_i32, %c0_i32_0 : i32, i32
  }
  func.func @transform_6(%arg0: i32) -> (i32, i32) {
    %c0_i32 = arith.constant 0 : i32
    %c0_i32_0 = arith.constant 0 : i32
    %c0_i32_1 = arith.constant 0 : i32
    return %c0_i32, %c0_i32_0 : i32, i32
  }
  func.func @transform_7(%arg0: i32) -> (i32, i32) {
    %c0_i32 = arith.constant 0 : i32
    %c0_i32_0 = arith.constant 0 : i32
    %c0_i32_1 = arith.constant 0 : i32
    return %c0_i32, %c0_i32_0 : i32, i32
  }
  func.func @transform_8(%arg0: i32) -> (i32, i32) {
    %c0_i32 = arith.constant 0 : i32
    %c0_i32_0 = arith.constant 0 : i32
    return %arg0, %c0_i32 : i32, i32
  }
}

</mosaic_0001>

<bundles_post_ra>
// kernel: custom-call.11
= control target key start
LH: loop header
LB: loop body
LE: loop exit
PB: predicated region body
PF: predicated region fallthrough
CT: control target
= control target key end

     0   :  { %5 = vsyncpa [#allocation6], 0  ;;  %v77_v1 = vlaneseq  ;;  %v534_v2 = vmov 0   ;;  %s563_s14 = smov 0   ;;  %s604_s0 = inlined_call_operand.vmem [shape: f32[3,3], index: 0, kind: input, shape index: {}]   ;;  %s605_s1 = inlined_call_operand.vmem [shape: f32[3,3], index: 1, kind: output, shape index: {0}]   ;;  %s606_s2 = inlined_call_operand.hbm [shape: s32[3], index: 2, kind: output, shape index: {1}]   ;;  %s607_s3 = inlined_call_operand.vmem [shape: s32[3], index: 3, kind: output, shape index: {2}]  }
   0x1   :  { %v67_v0 = vld [vmem:[%s604_s0] sm:$0xf]  ;;  %76 = vst [vmem:[#allocation4] sm:$0x1] %v534_v2 }
   0x2   :  { %68 = vst [vmem:[#allocation1] sm:$0xf] %v67_v0  ;;  %v560_v3 = vshrl.u32 %v77_v1, 7 }
   0x4   :  { %81 = vst [vmem:[#allocation9] sm:$0xff] %v560_v3 }
   0x9   :  { %v72_v4 = vld [vmem:[#allocation1] sm:$0xf] }
   0xa   :  { %73 = vst [vmem:[#allocation0] sm:$0xf] %v72_v4 }
  0x11   :  { %v74_v5 = vld [vmem:[#allocation0] sm:$0xff] }
  0x12   :  { %75 = vst [vmem:[#allocation2] sm:$0xff] %v74_v5 }
  0x13 LB: > { %vm97_vm0 = vcmp.lt.s32.totalorder %v560_v3, 3  ;;  %v570_v8 = vstv %s532_s14  ;;  %s138_s0 = ssub.s32 128, %s532_s14  ;;  %v144_v38 = vand.u32 127, %v77_v1  ;;  %v147_v40 = vld [vmem:[#allocation4] ss:$0 sm:$0xff]  ;;  %s150_s15 = scalar_lea.vmem [#allocation2], %s532_s14  ;;  %s532_s14 = sphi %s563_s14, %s87_s14  }
  0x14   : > { %vm96_vm1 = vcmp.ge.s32.totalorder %v560_v3, %v570_v8  ;;  %s156_s17 = scalar_lea.vmem [#allocation9], %s532_s14  ;;  %vm176_vm15 = vcmp.gt.s32.totalorder %v560_v3, %v570_v8  ;;  %s87_s14 = sadd.s32 1, %s532_s14  }
  0x15   : > { %vm98_vm3 = vmand %vm96_vm1, %vm97_vm0  ;;  %vm168_vm12 = vcmp.gt.s32.totalorder %v144_v38, %v570_v8  ;;  %vm145_vm13 = vcmp.eq.s32.totalorder %v144_v38, %v570_v8  ;;  %v158_v42 = vld [vmem:[%s156_s17] ss:$0 sm:$0xff]  ;;  %p84_p0 = scmp.ge.s32.totalorder %s87_s14, 3  }
  0x16   : > { %vm180_vm1 = vmand %vm176_vm15, %vm145_vm13  ;;  %s535_s20 = smov (%p84_p0), [#allocation5]  }
  0x17   :  { %s328_s21 = sshll.u32 (%p84_p0), %s535_s20, 4  ;;  %s329_s21 = int_to_ptr.vmem [resolvable:$true] %s328_s21 }
  0x18   :  { %s504_s24 = scalar_lea.vmem (%p84_p0), %s329_s21, 16  ;;  %s508_s25 = scalar_lea.vmem (%p84_p0), %s329_s21, 32 }
  0x19   : > { %v92_v6 = vld [vmem:[#allocation2] sm:$0xff]  ;;  %v152_v41 = vld [vmem:[%s150_s15] ss:$0 sm:$0xff]  ;;  %p505_p1 = scmp.ne.s32.totalorder (%p84_p0), %s329_s21, %s504_s24  ;;  %p509_p2 = scmp.lt.s32.totalorder (%p84_p0), %s329_s21, %s329_s21 }
  0x1a   : > { %v93_v7 = vand.u32 2147483647, %v92_v6  ;;  %p510_p3 = scmp.lt.s32.totalorder (%p84_p0), %s508_s25, %s504_s24 }
  0x1c   : > { %vm483_vm2 = vcmp.gt.f32.partialorder %v93_v7, -inf  ;;  %p511_p4 = por (%p84_p0), %p510_p3, %p509_p2 }
  0x1d   : > { %vm100_vm4 = vmand %vm98_vm3, %vm483_vm2 }
  0x1e   : > { %v101_v9 = vsel %vm100_vm4, %v560_v3, %v570_v8  ;;  %v102_v10 = vsel %vm100_vm4, %v93_v7, -inf  ;;  %p512_p5 = pnand (%p84_p0), %p511_p4, %p505_p1 }
  0x1f   : > { %v103_v11 = vrot.slane %v102_v10, 1  ;;  %v104_v12 = vrot.slane %v101_v9, 1 }
  0x21   : > { %vm105_vm5 = vcmp.ge.f32.partialorder %v103_v11, %v102_v10  ;;  %v108_v13 = vrot.slane %v103_v11, 1  ;;  %v109_v14 = vrot.slane %v104_v12, 1 }
  0x22   : > { %v106_v15 = vsel %vm105_vm5, %v103_v11, %v102_v10  ;;  %v107_v16 = vsel %vm105_vm5, %v104_v12, %v101_v9 }
  0x23   : > { %vm110_vm6 = vcmp.ge.f32.partialorder %v108_v13, %v106_v15  ;;  %v113_v17 = vrot.slane %v108_v13, 1  ;;  %v114_v18 = vrot.slane %v109_v14, 1 }
  0x24   : > { %v111_v19 = vsel %vm110_vm6, %v108_v13, %v106_v15  ;;  %v112_v20 = vsel %vm110_vm6, %v109_v14, %v107_v16 }
  0x25   : > { %vm115_vm7 = vcmp.ge.f32.partialorder %v113_v17, %v111_v19  ;;  %v118_v21 = vrot.slane %v113_v17, 1  ;;  %v119_v22 = vrot.slane %v114_v18, 1 }
  0x26   : > { %v116_v23 = vsel %vm115_vm7, %v113_v17, %v111_v19  ;;  %v117_v24 = vsel %vm115_vm7, %v114_v18, %v112_v20 }
  0x27   : > { %vm120_vm8 = vcmp.ge.f32.partialorder %v118_v21, %v116_v23  ;;  %v123_v25 = vrot.slane %v118_v21, 1  ;;  %v124_v26 = vrot.slane %v119_v22, 1 }
  0x28   : > { %v121_v27 = vsel %vm120_vm8, %v118_v21, %v116_v23  ;;  %v122_v28 = vsel %vm120_vm8, %v119_v22, %v117_v24 }
  0x29   : > { %vm125_vm9 = vcmp.ge.f32.partialorder %v123_v25, %v121_v27  ;;  %v128_v29 = vrot.slane %v123_v25, 1  ;;  %v129_v30 = vrot.slane %v124_v26, 1 }
  0x2a   : > { %v126_v31 = vsel %vm125_vm9, %v123_v25, %v121_v27  ;;  %v127_v32 = vsel %vm125_vm9, %v124_v26, %v122_v28 }
  0x2b   : > { %vm130_vm10 = vcmp.ge.f32.partialorder %v128_v29, %v126_v31  ;;  %v133_v33 = vrot.slane %v128_v29, 1  ;;  %v134_v34 = vrot.slane %v129_v30, 1 }
  0x2c   : > { %v131_v35 = vsel %vm130_vm10, %v128_v29, %v126_v31  ;;  %v132_v36 = vsel %vm130_vm10, %v129_v30, %v127_v32 }
  0x2d   : > { %vm135_vm11 = vcmp.ge.f32.partialorder %v133_v33, %v131_v35 }
  0x2e   : > { %v137_v37 = vsel %vm135_vm11, %v134_v34, %v132_v36 }
  0x2f   : > { %139 = vrot.lane.b32.xlu0 %v137_v37, %s138_s0 }
  0xa1   : > { %v140_v39 = vpop.permute.xlu0 %139 }
  0xa2   : > { %490 = vpush %v140_v39 }
  0xd3   : > { %s491_s16 = spop %490 }
  0xd4   : > { %v146_v43 = vstv %s491_s16  ;;  %s151_s18 = scalar_lea.vmem [#allocation2], %s491_s16  ;;  %s157_s19 = scalar_lea.vmem [#allocation9], %s491_s16 }
  0xd5   : > { %v153_v44 = vld [vmem:[%s151_s18] ss:$0 sm:$0xff]  ;;  %v148_v46 = vsel %vm145_vm13, %v146_v43, %v147_v40 }
  0xd6   : > { %v159_v45 = vld [vmem:[%s157_s19] ss:$0 sm:$0xff]  ;;  %154 = vst [vmem:[%s151_s18] sm:$0x1] %v152_v41  ;;  %vm162_vm14 = vcmp.ne.f32.partialorder %v153_v44, 0.0  ;;  %149 = vst [vmem:[#allocation4] sm:$0x1] %v148_v46 }
  0xd7   : > { %160 = vst [vmem:[%s157_s19] sm:$0x1] %v158_v42  ;;  %155 = vst [vmem:[%s150_s15] sm:$0x1] %v153_v44  ;;  %v169_v53 = vsel %vm168_vm12, %v153_v44, 0.0 }
  0xd8   : > { %161 = vst [vmem:[%s156_s17] sm:$0x1] %v159_v45  ;;  %vm163_vm0 = vmand %vm145_vm13, %vm162_vm14 }
  0xd9   : > { %v164_v47 = vsel %vm163_vm0, %v153_v44, 1.0 }
  0xda   : > { %v177_v48 = vsel %vm176_vm15, %v164_v47, 1.0 }
  0xdb   : > { %502 = vrcp.f32 %v177_v48 }
  0xdd   :  { %v248_v59 = vld [vmem:[#allocation4] sm:$0x1] (%p84_p0) }
  0xde   : > { %v173_v50 = vld [vmem:[#allocation2] sm:$0xff]  ;;  %251 = vst [vmem:[#allocation5] sm:$0x1] (%p84_p0), %v248_v59 }
  0xdf   :  { %v187_v57 = vld [vmem:[#allocation9] sm:$0xff] (%p84_p0) }
  0xe8   : > { %v503_v49 = vpop.eup %502 }
  0xe9   : > { %v179_v51 = vmul.f32 %v503_v49, %v173_v50 }
  0xeb   : > { %v181_v52 = vsel %vm180_vm1, %v179_v51, 0.0 }
  0xec   : > { %182 = vadd.xlane.f32.xlu0 %v181_v52 }
 0x119   :  { %203 = vxpose.xlu0.b32.start.end [1/1] (short) (narrow) (%p84_p0), %v187_v57, 8 }
 0x175   : > { %v183_v54 = vpop.xlane.xlu0 %182 }
 0x176   : > { %v184_v55 = vmul.f32 %v183_v54, %v169_v53  ;;  %86 = sbr.rel (!%p84_p0) target bundleno = 19 (0x13), region = 163 }
 0x178   : > { %v185_v56 = vsub.f32 %v179_v51, %v184_v55 }
 0x17a   : > { %186 = vst [vmem:[#allocation2] sm:$0xff] %v185_v56 }
 0x181   :  { %v240_v58 = vld [vmem:[#allocation2] sm:$0xf] }
 0x182   :  { %243 = vst [vmem:[#allocation3] sm:$0xf] %v240_v58 }
 0x189   :  { %v321_v60 = vld [vmem:[#allocation3] sm:$0xf] }
 0x18a   :  { %322 = vst [vmem:[%s605_s1] sm:$0xf] %v321_v60 }
 0x18b   :  { %515 = shalt.err (!%p512_p5)
}
 0x18c   :  { %331 = dma.vmem_to_hbm [thread:$0]  %s329_s21, 16, %s606_s2, [#allocation6]  }
 0x195   :  { %v219_v61 = vpop.trf.xlu0 }
 0x196   :  { %235 = vst [vmem:[#allocation7] sm:$0x1] %v219_v61 }
 0x19d   :  { %v256_v62 = vld [vmem:[#allocation7] sm:$0x1] }
 0x19e   :  { %259 = vst [vmem:[#allocation8] sm:$0x1] %v256_v62 }
 0x1a5   :  { %v395_v63 = vld [vmem:[#allocation8] sm:$0x1] }
 0x1a6   :  { %396 = vst [vmem:[%s607_s3] sm:$0x1] %v395_v63 }
 0x1a7   :  { %528 = dma.done.wait [#allocation6], 16  }
 0x1a8   :  { %529 = vsyncadd [#allocation6], 4294967280 }
 0x1a9   :  { %402 = vsyncpa [#allocation6], 1 }

// kernel: custom-call.13
= control target key start
LH: loop header
LB: loop body
LE: loop exit
PB: predicated region body
PF: predicated region fallthrough
CT: control target
= control target key end

     0   :  { %v40_v1 = vlaneseq  ;;  %v145_v11 = vmov -1.0   ;;  %s162_s0 = inlined_call_operand.vmem [shape: f32[1,3,3], index: 0, kind: input, shape index: {}]   ;;  %s163_s1 = inlined_call_operand.vmem [shape: f32[1,3,3], index: 1, kind: output, shape index: {}]  }
   0x1   :  { %v18_v0 = vld [vmem:[%s162_s0] sm:$0xf] }
   0x2   :  { %19 = vst [vmem:[#allocation1] sm:$0xf] %v18_v0  ;;  %v41_v3 = vand.u32 127, %v40_v1  ;;  %v44_v4 = vshrl.u32 %v40_v1, 7 }
   0x4   :  { %vm42_vm0 = vcmp.lt.s32.totalorder %v41_v3, 3  ;;  %vm51_vm1 = vcmp.ge.s32.totalorder %v44_v4, %v41_v3  ;;  %vm46_vm2 = vcmp.eq.s32.totalorder %v44_v4, %v41_v3  ;;  %vm65_vm4 = vcmp.eq.s32.totalorder %v41_v3, 0 }
   0x5   :  { %vm52_vm3 = vmand %vm51_vm1, %vm42_vm0  ;;  %vm62_vm5 = vcmp.eq.s32.totalorder %v41_v3, %v44_v4  ;;  %v66_v12 = vsel %vm65_vm4, 1.0, %v145_v11  ;;  %vm73_vm6 = vcmp.eq.s32.totalorder %v41_v3, 1  ;;  %vm83_vm7 = vcmp.eq.s32.totalorder %v41_v3, 2 }
   0x6   :  { %v67_v13 = vsel %vm62_vm5, %v66_v12, 0.0 }
   0x9   :  { %v38_v2 = vld [vmem:[#allocation1] sm:$0xf] }
   0xa   :  { %39 = vst [vmem:[#allocation0] sm:$0xf] %v38_v2 }
  0x11   :  { %v47_v5 = vld [vmem:[#allocation0] sm:$0xff] }
  0x12   :  { %v48_v6 = vsel %vm46_vm2, %v47_v5, 0.0  ;;  %v53_v7 = vsel %vm52_vm3, %v47_v5, 0.0 }
  0x13   :  { %49 = vadd.xlane.f32.xlu0 %v48_v6 }
  0x9c   :  { %v50_v8 = vpop.xlane.xlu0 %49 }
  0x9d   :  { %143 = vrcp.f32 %v50_v8  ;;  %vm90_vm8 = vweird.f32 %v50_v8 }
  0xaa   :  { %v144_v9 = vpop.eup %143 }
  0xab   :  { %v55_v10 = vmul.f32 %v144_v9, %v53_v7 }
  0xad   :  { %56 = vst [vmem:[#allocation4] sm:$0xff] %v55_v10 }
  0xb4   :  { %v69_v14 = vld [vmem:[#allocation4 + $0x1] ss:$0 sm:$0xff]  ;;  %v79_v17 = vld [vmem:[#allocation4 + $0x2] ss:$0 sm:$0xff] }
  0xb5   :  { %v70_v15 = vxor.u32 2147483648, %v69_v14  ;;  %v80_v19 = vxor.u32 2147483648, %v79_v17 }
  0xb7   :  { %v74_v16 = vmul.f32 %v70_v15, %v67_v13 }
  0xb9   :  { %75 = vadd.xlane.f32.xlu0 %v74_v16 }
 0x142   :  { %v76_v18 = vpop.xlane.xlu0 %75 }
 0x143   :  { %v77_v20 = vsel %vm73_vm6, %v76_v18, %v67_v13 }
 0x144   :  { %v84_v21 = vmul.f32 %v80_v19, %v77_v20 }
 0x146   :  { %85 = vadd.xlane.f32.xlu1 %v84_v21 }
 0x1cf   :  { %v86_v22 = vpop.xlane.xlu1 %85 }
 0x1d0   :  { %v87_v23 = vsel %vm83_vm7, %v86_v22, %v77_v20 }
 0x1d1   :  { %v89_v24 = vmul.f32 %v144_v9, %v87_v23 }
 0x1d3   :  { %v91_v25 = vsel %vm90_vm8, %v87_v23, %v89_v24 }
 0x1d4   :  { %92 = vst [vmem:[#allocation2] sm:$0xff] %v91_v25 }
 0x1db   :  { %v97_v26 = vld [vmem:[#allocation2] sm:$0xf] }
 0x1dc   :  { %100 = vst [vmem:[#allocation3] sm:$0xf] %v97_v26 }
 0x1e3   :  { %v117_v27 = vld [vmem:[#allocation3] sm:$0xf] }
 0x1e4   :  { %118 = vst [vmem:[%s163_s1] sm:$0xf] %v117_v27 }

// kernel: custom-call.12
= control target key start
LH: loop header
LB: loop body
LE: loop exit
PB: predicated region body
PF: predicated region fallthrough
CT: control target
= control target key end

     0   :  { %v40_v1 = vlaneseq  ;;  %v144_v11 = vmov -1.0   ;;  %s161_s0 = inlined_call_operand.vmem [shape: f32[1,3,3], index: 0, kind: input, shape index: {}]   ;;  %s162_s1 = inlined_call_operand.vmem [shape: f32[1,3,3], index: 1, kind: output, shape index: {}]  }
   0x1   :  { %v18_v0 = vld [vmem:[%s161_s0] sm:$0xf] }
   0x2   :  { %19 = vst [vmem:[#allocation1] sm:$0xf] %v18_v0  ;;  %v41_v3 = vand.u32 127, %v40_v1  ;;  %v44_v4 = vshrl.u32 %v40_v1, 7 }
   0x4   :  { %vm42_vm0 = vcmp.lt.s32.totalorder %v41_v3, 3  ;;  %vm51_vm1 = vcmp.le.s32.totalorder %v44_v4, %v41_v3  ;;  %vm46_vm2 = vcmp.eq.s32.totalorder %v44_v4, %v41_v3  ;;  %vm65_vm4 = vcmp.eq.s32.totalorder %v41_v3, 2 }
   0x5   :  { %vm52_vm3 = vmand %vm51_vm1, %vm42_vm0  ;;  %vm62_vm5 = vcmp.eq.s32.totalorder %v41_v3, %v44_v4  ;;  %v66_v12 = vsel %vm65_vm4, 1.0, %v144_v11  ;;  %vm73_vm6 = vcmp.eq.s32.totalorder %v41_v3, 1  ;;  %vm82_vm7 = vcmp.eq.s32.totalorder %v41_v3, 0 }
   0x6   :  { %v67_v13 = vsel %vm62_vm5, %v66_v12, 0.0 }
   0x9   :  { %v38_v2 = vld [vmem:[#allocation1] sm:$0xf] }
   0xa   :  { %39 = vst [vmem:[#allocation0] sm:$0xf] %v38_v2 }
  0x11   :  { %v47_v5 = vld [vmem:[#allocation0] sm:$0xff] }
  0x12   :  { %v48_v6 = vsel %vm46_vm2, %v47_v5, 0.0  ;;  %v53_v7 = vsel %vm52_vm3, %v47_v5, 0.0 }
  0x13   :  { %49 = vadd.xlane.f32.xlu0 %v48_v6 }
  0x9c   :  { %v50_v8 = vpop.xlane.xlu0 %49 }
  0x9d   :  { %142 = vrcp.f32 %v50_v8  ;;  %vm89_vm8 = vweird.f32 %v50_v8 }
  0xaa   :  { %v143_v9 = vpop.eup %142 }
  0xab   :  { %v55_v10 = vmul.f32 %v143_v9, %v53_v7 }
  0xad   :  { %56 = vst [vmem:[#allocation4] sm:$0xff] %v55_v10 }
  0xb4   :  { %v69_v14 = vld [vmem:[#allocation4 + $0x1] ss:$0 sm:$0xff]  ;;  %v78_v17 = vld [vmem:[#allocation4] ss:$0 sm:$0xff] }
  0xb5   :  { %v70_v15 = vxor.u32 2147483648, %v69_v14  ;;  %v79_v19 = vxor.u32 2147483648, %v78_v17 }
  0xb7   :  { %v74_v16 = vmul.f32 %v70_v15, %v67_v13 }
  0xb9   :  { %75 = vadd.xlane.f32.xlu0 %v74_v16 }
 0x142   :  { %v76_v18 = vpop.xlane.xlu0 %75 }
 0x143   :  { %v77_v20 = vsel %vm73_vm6, %v76_v18, %v67_v13 }
 0x144   :  { %v83_v21 = vmul.f32 %v79_v19, %v77_v20 }
 0x146   :  { %84 = vadd.xlane.f32.xlu1 %v83_v21 }
 0x1cf   :  { %v85_v22 = vpop.xlane.xlu1 %84 }
 0x1d0   :  { %v86_v23 = vsel %vm82_vm7, %v85_v22, %v77_v20 }
 0x1d1   :  { %v88_v24 = vmul.f32 %v143_v9, %v86_v23 }
 0x1d3   :  { %v90_v25 = vsel %vm89_vm8, %v86_v23, %v88_v24 }
 0x1d4   :  { %91 = vst [vmem:[#allocation2] sm:$0xff] %v90_v25 }
 0x1db   :  { %v96_v26 = vld [vmem:[#allocation2] sm:$0xf] }
 0x1dc   :  { %99 = vst [vmem:[#allocation3] sm:$0xf] %v96_v26 }
 0x1e3   :  { %v116_v27 = vld [vmem:[#allocation3] sm:$0xf] }
 0x1e4   :  { %117 = vst [vmem:[%s162_s1] sm:$0xf] %v116_v27 }

// kernel: pme_forward.1
= control target key start
LH: loop header
LB: loop body
LE: loop exit
PB: predicated region body
PF: predicated region fallthrough
CT: control target
= control target key end

     0   :  { %13 = vsyncpa [#allocation3], 0  ;;  %s1992_s27 = smov 0   ;;  %s2307_s0 = inlined_call_operand.vmem [shape: f32[8,16], index: 0, kind: input, shape index: {}]   ;;  %s2308_s1 = inlined_call_operand.vmem [shape: f32[16,8], index: 1, kind: input, shape index: {}]   ;;  %s2309_s2 = inlined_call_operand.vmem [shape: f32[3,3], index: 2, kind: input, shape index: {}]   ;;  %s2310_s3 = inlined_call_operand.vmem [shape: f32[6,45], index: 3, kind: input, shape index: {}]   ;;  %s2311_s4 = inlined_call_operand.vmem [shape: f32[45,90], index: 4, kind: input, shape index: {}]   ;;  %s2312_s5 = inlined_call_operand.vmem [shape: f32[14,210], index: 5, kind: input, shape index: {}]   ;;  %s2313_s6 = inlined_call_operand.vmem [shape: f32[15,210], index: 6, kind: input, shape index: {}]   ;;  %s2314_s7 = inlined_call_operand.vmem [shape: f32[16,210], index: 7, kind: input, shape index: {}]   ;;  %s2315_s8 = inlined_call_operand.vmem [shape: f32[16,128], index: 8, kind: output, shape index: {}]  }
   0x1 LB: > { %s1998_s28 = sadd.s32 4294967295, %s1929_s27   ;;  %p1744_p0 = scmp.ge.s32.totalorder %s1929_s27, 1  ;;  %s1929_s27 = sphi %s1992_s27, %s19_s27  }
   0x2   : > { %p218_p1 = scmp.lt.s32.totalorder %s1929_s27, 3  ;;  %s237_s9 = sshll.u32 %s2309_s2, 4  ;;  %s238_s9 = int_to_ptr.vmem [resolvable:$true] %s237_s9 }
   0x3   : > { %p1841_p4 = scmp.eq.s32.totalorder %s1998_s28, 0  ;;  %s1904_s11 = scalar_lea.vmem %s238_s9, 64 }
   0x4   : > { %p2006_p3 = pnand %p1744_p0, %p218_p1  ;;  %p1905_p7 = scmp.ne.s32.totalorder %s238_s9, %s1904_s11 }
   0x5   : > { %p1912_p11 = scmp.lt.s32.totalorder %s238_s9, %s238_s9  ;;  %p1913_p12 = scmp.lt.s32.totalorder %s1904_s11, %s1904_s11 }
   0x6   : > { %p1837_p5 = pneg %p2006_p3 }
   0x7   : > { %p1914_p13 = por %p1913_p12, %p1912_p11 }
   0x8   : > { %p1838_p6 = pnand %p1841_p4, %p1837_p5 }
   0xa   : > { %p1906_p8 = pneg %p1838_p6 }
   0xc   : > { %p1907_p9 = pnand %p1906_p8, %p1905_p7 }
   0xe   : > { %p1908_p10 = pneg %p1907_p9 }
  0x10   : > { %p1915_p2 = pnand %p1914_p13, %p1908_p10 }
  0x12   : > { %1918 = shalt.err (!%p1915_p2)
}
  0x13   : > { %s1931_s12 = smov [#allocation2]   ;;  %265 = sbr.rel (%p2006_p3) target bundleno = 1626 (0x65a), region = 52 }
  0x14   : > { %1840 = dma.vmem_to_smem (!%p1838_p6), %s238_s9, 64, %s1931_s12, [#allocation3]  }
  0x18   : > { %1924 = dma.done.wait (%p1841_p4), [#allocation3], 64  }
  0x19   : > { %1926 = vsyncadd (%p1841_p4), [#allocation3], 4294967232 }
  0x1a   : > { %271 = sfence }
  0x1b   : > { %p294_p0 = scmp.lt.s32.totalorder %s1998_s28, 1  ;;  %p2317_p1 = scmp.ne.s32.totalorder %s1998_s28, 0 }
  0x1c   : > { %s1757_s22 = sld [smem:[#allocation2 + $0x102]] (!%p2317_p1) }
  0x1d   : > { %s295_s13 = scalar_select %p294_p0, %s1998_s28, 1 }
  0x1e   : > { %301 = sbr.rel (%p2317_p1) target bundleno = 476 (0x1dc), region = 60  ;;  %s1754_s23 = sld [smem:[#allocation2 + $0x81]] (!%p2317_p1) }
  0x1f   : > { %s1748_s14 = sshll.u32 %s295_s13, 3  ;;  %s351_s24 = sld [smem:[#allocation2]] (!%p2317_p1) }
  0x20   : > { %s2026_s17 = scalar_lea.vmem %s2315_s8, %s1748_s14  ;;  %s1756_s29 = sld [smem:[#allocation2 + $0x101]] (!%p2317_p1) }
  0x21   : > { %s2048_s10 = sld [smem:[#allocation2 + $0x100]] (!%p2317_p1) }
  0x22   : > { %s2056_s11 = sld [smem:[#allocation2 + $0x80]] (!%p2317_p1) }
  0x23   : > { %v305_v0 = vld [vmem:[%s2308_s1] sm:$0xff]  ;;  %v1932_v1 = vmov 2   ;;  %v1933_v2 = vmov 1   ;;  %v306_v3 = vld [vmem:[%s2308_s1 + $0x8] sm:$0xff]  ;;  %v1934_v4 = vmov 0   ;;  %v1935_v5 = vmov 4  }
  0x24   : > { %1867 = vset.pattern.permute.xlu0 %v1932_v1  ;;  %1868 = vset.pattern.permute.xlu1 %v1933_v2  ;;  %v1936_v6 = vmov 3   ;;  %v2036_v7 = vstv %s1757_s22  ;;  %v2039_v8 = vstv %s1754_s23  ;;  %v1752_v9 = vld [vmem:[%s2307_s0 + $0x2] ss:$0 sm:$0xff]  ;;  %v1751_v15 = vld [vmem:[%s2307_s0 + $0x1] ss:$0 sm:$0xff]  ;;  %v448_v58 = vlaneseq }
  0x25   : > { %338 = vperm.xlu0 %1867, %v305_v0   ;;  %324 = vperm.xlu1 %1868, %v305_v0   ;;  %1874 = vrcp.f32 %v2036_v7  ;;  %v2050_v17 = vstv %s351_s24  ;;  %v1750_v32 = vld [vmem:[%s2307_s0] ss:$0 sm:$0xff]  ;;  %v1759_v62 = vld [vmem:[%s2307_s0 + $0x4] ss:$0 sm:$0xff]  ;;  %vm525_vm14 = vcmask 130048  }
  0x26   : > { %1876 = vrcp.f32 %v2039_v8  ;;  %v370_v20 = vstv %s1756_s29 }
  0x27   : > { %1878 = vrcp.f32 %v2050_v17  ;;  %v365_v30 = vstv %s2048_s10 }
  0x28   : > { %v387_v41 = vstv %s2056_s11 }
  0x29   : > { %342 = vperm.xlu0 %1867, %v306_v3   ;;  %328 = vperm.xlu1 %1868, %v306_v3  }
  0x2d   : > { %1869 = vset.pattern.permute.xlu0 %v1934_v4  ;;  %1870 = vset.pattern.permute.xlu1 %v1934_v4  ;;  %v449_v4 = vshrl.u32 %v448_v58, 7 }
  0x2e   : > { %309 = vperm.xlu0 %1869, %v305_v0   ;;  %314 = vperm.xlu1 %1870, %v306_v3  }
  0x32   : > { %1871 = vset.pattern.permute.xlu1 %v1935_v5  ;;  %1872 = vset.pattern.permute.xlu0 %v1935_v5  ;;  %v1875_v10 = vpop.eup %1874  ;;  %v452_v5 = vand.u32 127, %v448_v58 }
  0x33   : > { %435 = vperm.xlu1 %1871, %v305_v0   ;;  %439 = vperm.xlu0 %1872, %v306_v3   ;;  %v1877_v27 = vpop.eup %1876 }
  0x34   : > { %v1879_v49 = vpop.eup %1878  ;;  %vm455_vm0 = vcmp.ne.s32.totalorder %v449_v4, %v452_v5 }
  0x37   : > { %1873 = vset.pattern.permute.xlu1 %v1936_v6 }
  0x38   : > { %420 = vperm.xlu1 %1873, %v305_v0  }
  0x3c   : > { %424 = vperm.xlu1 %1873, %v306_v3  }
  0xa0   : > { %v339_v11 = vpop.permute.xlu0 %338  ;;  %v325_v14 = vpop.permute.xlu1 %324 }
  0xa1   : > { %v349_v12 = vsub.f32 %v339_v11, %v1752_v9  ;;  %v335_v22 = vsub.f32 %v325_v14, %v1751_v15 }
  0xa3   : > { %v359_v13 = vmul.f32 %v1875_v10, %v349_v12 }
  0xa4   : > { %v343_v16 = vpop.permute.xlu0 %342  ;;  %v329_v26 = vpop.permute.xlu1 %328 }
  0xa5   : > { %v361_v18 = vadd.f32 0.5, %v359_v13  ;;  %v2052_v19 = vsub.f32 %v343_v16, %v1752_v9  ;;  %v336_v34 = vsub.f32 %v329_v26, %v1751_v15 }
  0xa7   : > { %v363_v21 = vfloor.f32 %v361_v18  ;;  %v360_v23 = vmul.f32 %v1875_v10, %v2052_v19 }
  0xa9   : > { %v371_v24 = vmul.f32 %v370_v20, %v363_v21  ;;  %v362_v25 = vadd.f32 0.5, %v360_v23  ;;  %v310_v31 = vpop.permute.xlu0 %309  ;;  %v366_v39 = vmul.f32 %v365_v30, %v363_v21  ;;  %v315_v40 = vpop.permute.xlu1 %314  ;;  %v375_v59 = vmul.f32 %v363_v21, %v2036_v7 }
  0xaa   : > { %v321_v38 = vsub.f32 %v310_v31, %v1750_v32  ;;  %v322_v44 = vsub.f32 %v315_v40, %v1750_v32 }
  0xab   : > { %v373_v28 = vsub.f32 %v335_v22, %v371_v24  ;;  %v364_v29 = vfloor.f32 %v362_v25  ;;  %v377_v9 = vsub.f32 %v349_v12, %v375_v59 }
  0xac   : > { %v368_v46 = vsub.f32 %v321_v38, %v366_v39 }
  0xad   : > { %v381_v33 = vmul.f32 %v1877_v27, %v373_v28  ;;  %v372_v35 = vmul.f32 %v370_v20, %v364_v29  ;;  %v367_v48 = vmul.f32 %v365_v30, %v364_v29  ;;  %v376_v10 = vmul.f32 %v364_v29, %v2036_v7 }
  0xae   : > { %v436_v63 = vpop.permute.xlu1 %435  ;;  %v440_v14 = vpop.permute.xlu0 %439  ;;  %v414_v22 = vmul.f32 %v377_v9, %v377_v9 }
  0xaf   : > { %v383_v36 = vadd.f32 0.5, %v381_v33  ;;  %v374_v37 = vsub.f32 %v336_v34, %v372_v35  ;;  %v369_v53 = vsub.f32 %v322_v44, %v367_v48  ;;  %v446_v6 = vmul.f32 %v1759_v62, %v436_v63 }
  0xb0   : > { %v447_v21 = vmul.f32 %v1759_v62, %v440_v14  ;;  %v378_v23 = vsub.f32 %v2052_v19, %v376_v10 }
  0xb1   : > { %v385_v42 = vfloor.f32 %v383_v36  ;;  %v382_v43 = vmul.f32 %v1877_v27, %v374_v37  ;;  %vm453_vm1 = vcmp.gt.f32.partialorder %v446_v6, 0.5 }
  0xb2   : > { %vm457_vm2 = vmand %vm453_vm1, %vm455_vm0  ;;  %vm454_vm4 = vcmp.gt.f32.partialorder %v447_v21, 0.5  ;;  %v415_v27 = vmul.f32 %v378_v23, %v378_v23 }
  0xb3   : > { %v384_v45 = vadd.f32 0.5, %v382_v43  ;;  %v388_v47 = vmul.f32 %v387_v41, %v385_v42  ;;  %v392_v55 = vmul.f32 %v385_v42, %v2039_v8 }
  0xb5   : > { %v386_v50 = vfloor.f32 %v384_v45  ;;  %v390_v51 = vsub.f32 %v368_v46, %v388_v47  ;;  %v394_v0 = vsub.f32 %v373_v28, %v392_v55 }
  0xb7   : > { %v398_v52 = vmul.f32 %v1879_v49, %v390_v51  ;;  %v389_v54 = vmul.f32 %v387_v41, %v386_v50  ;;  %v393_v1 = vmul.f32 %v386_v50, %v2039_v8  ;;  %v410_v15 = vmul.f32 %v394_v0, %v394_v0 }
  0xb8   : > { %v450_v8 = vadd.s32 8, %v449_v4  ;;  %v1758_v4 = vld [vmem:[%s2307_s0 + $0x3] ss:$0 sm:$0xff] }
  0xb9   : > { %v400_v56 = vadd.f32 0.5, %v398_v52  ;;  %v391_v57 = vsub.f32 %v369_v53, %v389_v54  ;;  %v395_v16 = vsub.f32 %v374_v37, %v393_v1 }
  0xba   : > { %vm456_vm3 = vcmp.ne.s32.totalorder %v450_v8, %v452_v5  ;;  %v421_v5 = vpop.permute.xlu1 %420 }
  0xbb   : > { %v402_v60 = vfloor.f32 %v400_v56  ;;  %v399_v61 = vmul.f32 %v1879_v49, %v391_v57  ;;  %v411_v12 = vmul.f32 %v395_v16, %v395_v16  ;;  %vm458_vm7 = vmand %vm454_vm4, %vm456_vm3  ;;  %v431_v10 = vmul.f32 %v1758_v4, %v421_v5 }
  0xbd   : > { %v404_v2 = vmul.f32 %v402_v60, %v2050_v17  ;;  %v401_v3 = vadd.f32 0.5, %v399_v61 }
  0xbf   : > { %v406_v11 = vsub.f32 %v390_v51, %v404_v2  ;;  %v403_v13 = vfloor.f32 %v401_v3 }
  0xc1   : > { %v408_v18 = vmul.f32 %v406_v11, %v406_v11  ;;  %v405_v20 = vmul.f32 %v403_v13, %v2050_v17 }
  0xc3   : > { %v407_v24 = vsub.f32 %v391_v57, %v405_v20  ;;  %v412_v25 = vadd.f32 %v410_v15, %v408_v18  ;;  %v425_v18 = vpop.permute.xlu1 %424 }
  0xc5   : > { %v409_v26 = vmul.f32 %v407_v24, %v407_v24  ;;  %v416_v7 = vadd.f32 %v414_v22, %v412_v25  ;;  %v432_v24 = vmul.f32 %v1758_v4, %v425_v18 }
  0xc7   : > { %vm459_vm5 = vcmp.lt.f32.partialorder %v416_v7, 0.25  ;;  %v413_v28 = vadd.f32 %v411_v12, %v409_v26 }
  0xc8   : > { %vm2073_vm6 = vmand %vm457_vm2, %vm459_vm5 }
  0xc9   : > { %v463_v29 = vsel %vm2073_vm6, %v416_v7, 1.0  ;;  %v417_v30 = vadd.f32 %v415_v27, %v413_v28 }
  0xca   : > { %1880 = vrsqrt.f32 %v463_v29  ;;  %vm467_vm10 = vcmp.eq.f32.partialorder %v463_v29, inf  ;;  %v470_v34 = vand.u32 2147483648, %v463_v29  ;;  %vm469_vm11 = vcmp.eq.f32.partialorder %v463_v29, 0.0 }
  0xcb   : > { %vm460_vm8 = vcmp.lt.f32.partialorder %v417_v30, 0.25 }
  0xcc   : > { %vm2079_vm9 = vmand %vm458_vm7, %vm460_vm8 }
  0xcd   : > { %v464_v31 = vsel %vm2079_vm9, %v417_v30, 1.0 }
  0xce   : > { %1882 = vrsqrt.f32 %v464_v31  ;;  %vm474_vm12 = vcmp.eq.f32.partialorder %v464_v31, inf  ;;  %v477_v40 = vand.u32 2147483648, %v464_v31  ;;  %vm476_vm13 = vcmp.eq.f32.partialorder %v464_v31, 0.0 }
  0xd7   : > { %v1881_v32 = vpop.eup %1880 }
  0xd8   : > { %v466_v33 = vmul.f32 %v1881_v32, %v463_v29 }
  0xda   : > { %v468_v35 = vsel %vm467_vm10, %v463_v29, %v466_v33 }
  0xdb   : > { %v1883_v36 = vpop.eup %1882  ;;  %v471_v37 = vsel %vm469_vm11, %v470_v34, %v468_v35 }
  0xdc   : > { %v479_v38 = vmul.f32 4.985823, %v471_v37  ;;  %v473_v39 = vmul.f32 %v1883_v36, %v464_v31 }
  0xde   : > { %v481_v41 = vmul.f32 0.3275911, %v479_v38  ;;  %v475_v42 = vsel %vm474_vm12, %v464_v31, %v473_v39  ;;  %v507_v48 = vsub.f32 0.0, %v479_v38 }
  0xdf   : > { %v478_v43 = vsel %vm476_vm13, %v477_v40, %v475_v42 }
  0xe0   : > { %v483_v44 = vadd.f32 1.0, %v481_v41  ;;  %v480_v45 = vmul.f32 4.985823, %v478_v43  ;;  %v509_v50 = vmul.f32 %v507_v48, %v479_v38 }
  0xe2   : > { %1884 = vrcp.f32 %v483_v44  ;;  %v482_v46 = vmul.f32 0.3275911, %v480_v45  ;;  %v508_v49 = vsub.f32 0.0, %v480_v45  ;;  %v511_v53 = vmul.f32 1.442695, %v509_v50 }
  0xe4   : > { %v484_v47 = vadd.f32 1.0, %v482_v46  ;;  %v510_v54 = vmul.f32 %v508_v49, %v480_v45 }
  0xe6   : > { %1886 = vrcp.f32 %v484_v47  ;;  %v513_v59 = vmul.f32 1.442695, %v510_v54 }
  0xe7   : > { %1888 = vpow2.f32 %v511_v53 }
  0xe8   : > { %1890 = vrcp.f32 %v471_v37 }
  0xe9   : > { %1892 = vpow2.f32 %v513_v59 }
  0xea   : > { %1894 = vrcp.f32 %v478_v43 }
  0xef   : > { %v1885_v51 = vpop.eup %1884 }
  0xf0   : > { %v489_v52 = vmul.f32 1.0614054, %v1885_v51 }
  0xf2   : > { %v491_v55 = vadd.f32 -1.4531521, %v489_v52 }
  0xf3   : > { %v1887_v56 = vpop.eup %1886 }
  0xf4   : > { %v493_v57 = vmul.f32 %v1885_v51, %v491_v55  ;;  %v490_v58 = vmul.f32 1.0614054, %v1887_v56  ;;  %v1889_v14 = vpop.eup %1888 }
  0xf5   : > { %v1891_v20 = vpop.eup %1890 }
  0xf6   : > { %v495_v60 = vadd.f32 1.4214138, %v493_v57  ;;  %v492_v61 = vadd.f32 -1.4531521, %v490_v58  ;;  %v1893_v22 = vpop.eup %1892 }
  0xf7   : > { %v1895_v26 = vpop.eup %1894 }
  0xf8   : > { %v497_v62 = vmul.f32 %v1885_v51, %v495_v60  ;;  %v494_v63 = vmul.f32 %v1887_v56, %v492_v61 }
  0xfa   : > { %v499_v0 = vadd.f32 -0.28449672, %v497_v62  ;;  %v496_v1 = vadd.f32 1.4214138, %v494_v63 }
  0xfc   : > { %v501_v2 = vmul.f32 %v1885_v51, %v499_v0  ;;  %v498_v3 = vmul.f32 %v1887_v56, %v496_v1 }
  0xfe   : > { %v503_v6 = vadd.f32 0.2548296, %v501_v2  ;;  %v500_v9 = vadd.f32 -0.28449672, %v498_v3 }
 0x100   : > { %v505_v11 = vmul.f32 %v1885_v51, %v503_v6  ;;  %v502_v13 = vmul.f32 %v1887_v56, %v500_v9 }
 0x102   : > { %v515_v15 = vmul.f32 %v1889_v14, %v505_v11  ;;  %v504_v16 = vadd.f32 0.2548296, %v502_v13 }
 0x104   : > { %v517_v8 = vmul.f32 %v515_v15, %v431_v10  ;;  %v506_v21 = vmul.f32 %v1887_v56, %v504_v16 }
 0x106   : > { %v520_v23 = vmul.f32 %v1891_v20, %v517_v8  ;;  %v516_v25 = vmul.f32 %v1893_v22, %v506_v21 }
 0x108   : > { %v518_v12 = vmul.f32 %v516_v25, %v432_v24  ;;  %v523_v27 = vsel %vm2073_vm6, %v520_v23, 0.0 }
 0x109   : > { %v526_v29 = vsel %vm525_vm14, %v523_v27, 0.0 }
 0x10a   : > { %v522_v7 = vmul.f32 %v1895_v26, %v518_v12 }
 0x10c   : > { %v524_v28 = vsel %vm2079_vm9, %v522_v7, 0.0 }
 0x10d   : > { %v527_v30 = vsel %vm525_vm14, %v524_v28, 0.0 }
 0x10e   : > { %v528_v31 = vadd.f32 %v527_v30, %v526_v29 }
 0x110   : > { %529 = vadd.xlane.f32.xlu0 %v528_v31 }
 0x199   : > { %v530_v32 = vpop.xlane.xlu0 %529 }
 0x19a   : > { %v531_v33 = vrot.slane %v530_v32, 4 }
 0x19c   : > { %v532_v34 = vadd.f32 %v531_v33, %v530_v32 }
 0x19e   : > { %v533_v35 = vrot.slane %v532_v34, 2 }
 0x1a0   : > { %v534_v36 = vadd.f32 %v533_v35, %v532_v34 }
 0x1a2   : > { %v535_v37 = vrot.slane %v534_v36, 1 }
 0x1a4   : > { %v536_v38 = vadd.f32 %v535_v37, %v534_v36 }
 0x1a6   : > { %1827 = vpush %v536_v38 }
 0x1d7   : > { %s1828_s19 = spop %1827 }
 0x1d8   : > { %s538_s20 = smul.f32 69.4675, %s1828_s19 }
 0x1da   : > { %v539_v17 = vstv %s538_s20 }
 0x1db   : > { %540 = vst [vmem:[%s2026_s17] sm:$0xff] %v539_v17 }
 0x1dc PF: > { %p1760_p2 = scmp.ne.s32.totalorder %s1998_s28, 1 }
 0x1dd   : > { %s1942_s28 = smov (!%p1760_p2), 100   ;;  %s1943_s25 = smov (!%p1760_p2), 114  }
 0x1de   : > { %544 = sbr.rel (%p1760_p2) target bundleno = 1626 (0x65a), region = 64  ;;  %s1944_s26 = smov (!%p1760_p2), 70  }
 0x1df   : > { %s1945_s29 = smov (!%p1760_p2), 85   ;;  %s1946_s30 = smov (!%p1760_p2), 54  }
 0x1e3   : > { %v2097_v19 = vld [vmem:[%s2308_s1 + $0x8] sm:$0xff]  ;;  %v2102_v39 = vld [vmem:[%s2308_s1] sm:$0xff]  ;;  %v1937_v40 = vmov 5   ;;  %v1938_v41 = vmov 6   ;;  %v1939_v42 = vmov 7   ;;  %vm755_vm15 = vcmask 1044480  }
 0x1e4   : > { %1898 = vset.pattern.permute.xlu1 %v1937_v40  ;;  %1896 = vset.pattern.permute.xlu0 %v1937_v40  ;;  %v747_v43 = vld [vmem:[%s2311_s4 + $0x28] sm:$0x1f]  ;;  %v746_v44 = vld [vmem:[%s2311_s4 + $0x20] sm:$0xff]  ;;  %v745_v45 = vld [vmem:[%s2311_s4 + $0x18] sm:$0xff]  ;;  %vm845_vm0 = vcmask 1045504  }
 0x1e5   : > { %560 = vperm.xlu1 %1898, %v2097_v19   ;;  %555 = vperm.xlu0 %1896, %v2102_v39   ;;  %v744_v46 = vld [vmem:[%s2311_s4 + $0x10] sm:$0xff]  ;;  %v743_v47 = vld [vmem:[%s2311_s4 + $0x8] sm:$0xff]  ;;  %v742_v48 = vld [vmem:[%s2311_s4] sm:$0xff] }
 0x1e6   : > { %1812 = vmatprep.subr.msk.mxu0 %vm755_vm15, %v747_v43  ;;  %v2131_v49 = vld [vmem:[%s2312_s5 + $0x18] sm:$0x3f]  ;;  %v1762_v52 = vld [vmem:[%s2310_s3 + $0x4] ss:$0 sm:$0xff]  ;;  %v1761_v55 = vld [vmem:[%s2310_s3 + $0x3] ss:$0 sm:$0xff] }
 0x1e7   : > { %1813 = vmatpush3.msk.msra.mxu0 %vm755_vm15, %v747_v43  ;;  %1778 = vmatprep.subr.msk.mxu1 %vm845_vm0, %v2131_v49  ;;  %v1763_v58 = vld [vmem:[%s2310_s3 + $0x5] ss:$0 sm:$0xff]  ;;  %v1764_v3 = vld [vmem:[%s2310_s3] ss:$0 sm:$0xff]  ;;  %v1765_v6 = vld [vmem:[%s2310_s3 + $0x2] ss:$0 sm:$0xff] }
 0x1e8   : > { %1814 = vmatprep.subr.mxu0 %v746_v44  ;;  %v1766_v14 = vld [vmem:[%s2310_s3 + $0x1] ss:$0 sm:$0xff] }
 0x1e9   : > { %1899 = vset.pattern.permute.xlu1 %v1938_v41  ;;  %1897 = vset.pattern.permute.xlu0 %v1938_v41 }
 0x1ea   : > { %574 = vperm.xlu1 %1899, %v2097_v19   ;;  %570 = vperm.xlu0 %1897, %v2102_v39  }
 0x1eb   : > { %1815 = vmatpush3.msra.mxu0 %v746_v44 }
 0x1ec   : > { %1816 = vmatprep.subr.mxu0 %v745_v45 }
 0x1ed   : > { %1817 = vmatpush3.msra.mxu0 %v745_v45 }
 0x1ee   : > { %1900 = vset.pattern.permute.xlu1 %v1939_v42  ;;  %1901 = vset.pattern.permute.xlu0 %v1939_v42 }
 0x1ef   : > { %586 = vperm.xlu1 %1900, %v2102_v39   ;;  %590 = vperm.xlu0 %1901, %v2097_v19  }
 0x1f0   : > { %1818 = vmatprep.subr.mxu0 %v744_v46 }
 0x1f1   : > { %1819 = vmatpush3.msra.mxu0 %v744_v46 }
 0x1f2   : > { %1820 = vmatprep.subr.mxu0 %v743_v47 }
 0x1f3   : > { %1821 = vmatpush3.msra.mxu0 %v743_v47 }
 0x1f4   : > { %1822 = vmatprep.subr.mxu0 %v742_v48 }
 0x1f5   : > { %1823 = vmatpush3.msra.mxu0 %v742_v48 }
 0x260   : > { %v561_v50 = vpop.permute.xlu1 %560  ;;  %v556_v51 = vpop.permute.xlu0 %555 }
 0x261   : > { %v568_v59 = vmul.f32 %v1761_v55, %v561_v50  ;;  %v567_v60 = vmul.f32 %v1761_v55, %v556_v51 }
 0x265   : > { %v575_v53 = vpop.permute.xlu1 %574  ;;  %v571_v54 = vpop.permute.xlu0 %570 }
 0x266   : > { %v582_v56 = vmul.f32 %v1762_v52, %v575_v53  ;;  %v581_v57 = vmul.f32 %v1762_v52, %v571_v54 }
 0x268   : > { %v584_v63 = vadd.f32 %v582_v56, %v568_v59  ;;  %v583_v0 = vadd.f32 %v581_v57, %v567_v60 }
 0x26a   : > { %v587_v61 = vpop.permute.xlu1 %586  ;;  %v591_v62 = vpop.permute.xlu0 %590 }
 0x26b   : > { %v597_v1 = vmul.f32 %v1763_v58, %v587_v61  ;;  %v598_v2 = vmul.f32 %v1763_v58, %v591_v62 }
 0x26d   : > { %v599_v4 = vadd.f32 %v597_v1, %v583_v0  ;;  %v600_v5 = vadd.f32 %v598_v2, %v584_v63 }
 0x26f   : > { %v605_v9 = vsub.f32 %v599_v4, %v1764_v3  ;;  %v606_v10 = vsub.f32 %v600_v5, %v1764_v3 }
 0x271   : > { %v611_v11 = vmul.f32 %v1765_v6, %v605_v9  ;;  %v612_v13 = vmul.f32 %v1765_v6, %v606_v10 }
 0x273   : > { %v613_v15 = vfloor.f32 %v611_v11  ;;  %v614_v16 = vfloor.f32 %v612_v13 }
 0x275   : > { %v619_v18 = vmul.f32 %v1766_v14, %v613_v15  ;;  %v620_v20 = vmul.f32 %v1766_v14, %v614_v16 }
 0x277   : > { %v2153_v8 = vsub.f32 %v605_v9, %v619_v18  ;;  %v2155_v21 = vsub.f32 %v606_v10, %v620_v20 }
 0x279   : > { %v2158_v22 = vadd.f32 -1.0, %v2153_v8  ;;  %vm623_vm1 = vcmp.gt.f32.partialorder %v2153_v8, 0.0  ;;  %vm625_vm2 = vcmp.lt.f32.partialorder %v2153_v8, 2.0  ;;  %v639_v25 = vsub.f32 3.0, %v2153_v8 }
 0x27a   : > { %v2166_v12 = vadd.f32 -1.0, %v2155_v21  ;;  %vm2170_vm5 = vmand %vm623_vm1, %vm625_vm2  ;;  %vm624_vm6 = vcmp.gt.f32.partialorder %v2155_v21, 0.0  ;;  %vm626_vm7 = vcmp.lt.f32.partialorder %v2155_v21, 2.0  ;;  %v640_v48 = vsub.f32 3.0, %v2155_v21 }
 0x27b   : > { %v631_v23 = vand.u32 2147483647, %v2158_v22  ;;  %v1769_v24 = vadd.f32 -1.0, %v2158_v22  ;;  %vm641_vm3 = vcmp.gt.f32.partialorder %v2158_v22, 0.0  ;;  %vm643_vm4 = vcmp.lt.f32.partialorder %v2158_v22, 2.0  ;;  %vm2191_vm13 = vmand %vm624_vm6, %vm626_vm7 }
 0x27c   : > { %v632_v29 = vand.u32 2147483647, %v2166_v12  ;;  %v2180_v32 = vadd.f32 -1.0, %v2166_v12  ;;  %vm645_vm9 = vmand %vm641_vm3, %vm643_vm4  ;;  %vm642_vm11 = vcmp.gt.f32.partialorder %v2166_v12, 0.0  ;;  %vm644_vm12 = vcmp.lt.f32.partialorder %v2166_v12, 2.0 }
 0x27d   : > { %v633_v26 = vsub.f32 1.0, %v631_v23  ;;  %v649_v7 = vand.u32 2147483647, %v1769_v24  ;;  %v1771_v28 = vadd.f32 -1.0, %v1769_v24  ;;  %vm670_vm8 = vcmp.gt.f32.partialorder %v1769_v24, 0.0  ;;  %vm646_vm2 = vmand %vm642_vm11, %vm644_vm12 }
 0x27e   : > { %vm672_vm10 = vcmp.lt.f32.partialorder %v1769_v24, 2.0  ;;  %v634_v36 = vsub.f32 1.0, %v632_v29  ;;  %v650_v37 = vand.u32 2147483647, %v2180_v32  ;;  %v668_v40 = vsub.f32 3.0, %v2158_v22 }
 0x27f   : > { %v635_v30 = vsel %vm2170_vm5, %v633_v26, 0.0  ;;  %v651_v31 = vsub.f32 1.0, %v649_v7  ;;  %v678_v33 = vand.u32 2147483647, %v1771_v28  ;;  %v1773_v35 = vadd.f32 -1.0, %v1771_v28  ;;  %vm674_vm14 = vmand %vm670_vm8, %vm672_vm10 }
 0x280   : > { %v637_v38 = vmul.f32 %v635_v30, %v2153_v8  ;;  %vm709_vm15 = vcmp.gt.f32.partialorder %v1771_v28, 0.0  ;;  %vm711_vm1 = vcmp.lt.f32.partialorder %v1771_v28, 2.0  ;;  %v652_v44 = vsub.f32 1.0, %v650_v37 }
 0x281   : > { %v653_v34 = vsel %vm645_vm9, %v651_v31, 0.0  ;;  %v680_v41 = vsub.f32 1.0, %v678_v33  ;;  %v717_v43 = vand.u32 2147483647, %v1773_v35  ;;  %v636_v52 = vsel %vm2191_vm13, %v634_v36, 0.0  ;;  %vm713_vm3 = vmand %vm709_vm15, %vm711_vm1 }
 0x282   : > { %v655_v17 = vmul.f32 %v653_v34, %v639_v25  ;;  %v666_v46 = vmul.f32 %v2158_v22, %v653_v34  ;;  %v654_v53 = vsel %vm646_vm2, %v652_v44, 0.0  ;;  %v707_v55 = vsub.f32 3.0, %v1769_v24 }
 0x283   : > { %v682_v47 = vsel %vm674_vm14, %v680_v41, 0.0  ;;  %v719_v51 = vsub.f32 1.0, %v717_v43  ;;  %v656_v58 = vmul.f32 %v654_v53, %v640_v48  ;;  %v1772_v59 = vadd.f32 -1.0, %v2180_v32 }
 0x284   : > { %v657_v45 = vadd.f32 %v655_v17, %v637_v38  ;;  %v684_v50 = vmul.f32 %v682_v47, %v668_v40  ;;  %v664_v60 = vsub.f32 4.0, %v2153_v8  ;;  %v705_v61 = vmul.f32 %v1769_v24, %v682_v47 }
 0x285   : > { %v721_v57 = vsel %vm713_vm3, %v719_v51, 0.0  ;;  %v638_v63 = vmul.f32 %v636_v52, %v2155_v21  ;;  %vm671_vm4 = vcmp.gt.f32.partialorder %v2180_v32, 0.0  ;;  %vm673_vm5 = vcmp.lt.f32.partialorder %v2180_v32, 2.0 }
 0x286   : > { %v660_v54 = vmul.f32 0.5, %v657_v45  ;;  %v686_v56 = vadd.f32 %v684_v50, %v666_v46  ;;  %v723_v62 = vmul.f32 %v721_v57, %v707_v55  ;;  %v679_v1 = vand.u32 2147483647, %v1772_v59  ;;  %vm675_vm6 = vmand %vm671_vm4, %vm673_vm5  ;;  %v834_v57 = vld [vmem:[%s2312_s5] sm:$0xff] }
 0x287   : > { %v703_v2 = vsub.f32 4.0, %v2158_v22  ;;  %v669_v4 = vsub.f32 3.0, %v2166_v12  ;;  %v1774_v5 = vadd.f32 -1.0, %v1772_v59  ;;  %v658_v10 = vadd.f32 %v656_v58, %v638_v63 }
 0x288   : > { %v688_v0 = vmul.f32 0.5, %v686_v56  ;;  %v725_v3 = vadd.f32 %v723_v62, %v705_v61  ;;  %v662_v6 = vmul.f32 %v660_v54, %v2153_v8  ;;  %v681_v11 = vsub.f32 1.0, %v679_v1  ;;  %v836_v56 = vld [vmem:[%s2312_s5 + $0x10] sm:$0x3f]  ;;  %v1015_v61 = vld [vmem:[%s2313_s6 + $0x8] sm:$0xff] }
 0x289   : > { %vm710_vm7 = vcmp.gt.f32.partialorder %v1772_v59, 0.0  ;;  %vm712_vm8 = vcmp.lt.f32.partialorder %v1772_v59, 2.0  ;;  %v718_v14 = vand.u32 2147483647, %v1774_v5  ;;  %v667_v16 = vmul.f32 %v2166_v12, %v654_v53  ;;  %1779 = vmatpush1.msk.msra.mxu1 %vm845_vm0, %v836_v56  ;;  %v1017_v59 = vld [vmem:[%s2313_s6 + $0x18] sm:$0x7f] }
 0x28a   : > { %v690_v9 = vmul.f32 %v688_v0, %v664_v60  ;;  %v727_v13 = vmul.f32 0.5, %v725_v3  ;;  %v683_v18 = vsel %vm675_vm6, %v681_v11, 0.0  ;;  %v701_v20 = vmul.f32 %v2158_v22, %v688_v0  ;;  %vm714_vm9 = vmand %vm710_vm7, %vm712_vm8  ;;  %v1016_v60 = vld [vmem:[%s2313_s6 + $0x10] sm:$0x7f] }
 0x28b   : > { %v685_v24 = vmul.f32 %v683_v18, %v669_v4  ;;  %v720_v25 = vsub.f32 1.0, %v718_v14  ;;  %v661_v26 = vmul.f32 0.5, %v658_v10  ;;  %v708_v7 = vsub.f32 3.0, %v2180_v32 }
 0x28c   : > { %v692_v15 = vadd.f32 %v690_v9, %v662_v6  ;;  %v729_v23 = vmul.f32 %v727_v13, %v703_v2  ;;  %v706_v31 = vmul.f32 %v2180_v32, %v683_v18  ;;  %v699_v34 = vsub.f32 5.0, %v2153_v8 }
 0x28d   : > { %v687_v29 = vadd.f32 %v685_v24, %v667_v16  ;;  %v722_v30 = vsel %vm714_vm9, %v720_v25, 0.0  ;;  %v665_v36 = vsub.f32 4.0, %v2155_v21  ;;  %v663_v40 = vmul.f32 %v661_v26, %v2155_v21 }
 0x28e   : > { %v695_v27 = vmul.f32 0.33333334, %v692_v15  ;;  %v731_v28 = vadd.f32 %v729_v23, %v701_v20  ;;  %v724_v33 = vmul.f32 %v722_v30, %v708_v7  ;;  %v704_v42 = vsub.f32 4.0, %v2166_v12 }
 0x28f   : > { %v689_v22 = vmul.f32 0.5, %v687_v29  ;;  %vm748_vm10 = vcmask 367616   ;;  %v700_v51 = vsub.f32 5.0, %v2155_v21  ;;  %v1941_v58 = vmov 3  }
 0x290   : > { %v733_v35 = vmul.f32 0.33333334, %v731_v28  ;;  %v726_v37 = vadd.f32 %v724_v33, %v706_v31  ;;  %v697_v38 = vmul.f32 %v695_v27, %v2153_v8  ;;  %1903 = vset.pattern.permute.xlu1 %v1941_v58  ;;  %1902 = vset.pattern.permute.xlu0 %v1941_v58  ;;  %vm1027_vm11 = vcmask 1046528  }
 0x291   : > { %v691_v41 = vmul.f32 %v689_v22, %v665_v36  ;;  %v702_v32 = vmul.f32 %v2166_v12, %v689_v22  ;;  %v835_v12 = vld [vmem:[%s2312_s5 + $0x8] sm:$0xff]  ;;  %1786 = vmatprep.subr.msk.mxu0 %vm1027_vm11, %v1017_v59  ;;  %vm838_vm12 = vcmask 113664   ;;  %vm1312_vm13 = vcmask 130048  }
 0x292   : > { %v735_v17 = vmul.f32 %v733_v35, %v699_v34  ;;  %v728_v43 = vmul.f32 0.5, %v726_v37  ;;  %882 = vmatprep.subr.mxu1 %v835_v12  ;;  %vm1674_vm14 = vcmask 122880   ;;  %vm1657_vm15 = vcmask 670720  }
 0x293   : > { %v693_v45 = vadd.f32 %v691_v41, %v663_v40  ;;  %883 = vmatpush1.msra.mxu1 %v834_v57 }
 0x294   : > { %v737_v44 = vadd.f32 %v735_v17, %v697_v38  ;;  %v730_v46 = vmul.f32 %v728_v43, %v704_v42  ;;  %1782 = vmatprep.subr.msk.mxu1 %vm845_vm0, %v2131_v49  ;;  %v1014_v49 = vld [vmem:[%s2313_s6] sm:$0xff] }
 0x295   : > { %v696_v48 = vmul.f32 0.33333334, %v693_v45 }
 0x296   : > { %v740_v47 = vmul.f32 0.25, %v737_v44  ;;  %v732_v50 = vadd.f32 %v730_v46, %v702_v32 }
 0x297   : > { %v698_v52 = vmul.f32 %v696_v48, %v2155_v21  ;;  %v1940_v21 = vmov 0.0  }
 0x298   : > { %1824 = vmatprep.mubr.msk.f32.mxu0 %vm748_vm10, %v740_v47  ;;  %v734_v8 = vmul.f32 0.33333334, %v732_v50  ;;  %916 = vmatprep.mubr.f32.mxu1 %v1940_v21 }
 0x29a   : > { %v736_v53 = vmul.f32 %v734_v8, %v700_v51 }
 0x29c   : > { %v738_v54 = vadd.f32 %v736_v53, %v698_v52 }
 0x29e   : > { %v741_v55 = vmul.f32 0.25, %v738_v54 }
 0x2a0   : > { %1825 = vmatmul.mubr.msk.f32.vlgmr.msra.gmra.mxu0 %vm748_vm10, %v741_v55 }
 0x2a1   : > { %1098 = vmatprep.mubr.f32.mxu0 %v1940_v21  ;;  %1787 = vmatpush1.msk.msra.mxu0 %vm1027_vm11, %v1016_v60 }
 0x2a2   : > { %1064 = vmatprep.subr.mxu0 %v1015_v61 }
 0x2a3   : > { %1065 = vmatpush1.msra.mxu0 %v1014_v49 }
 0x360   : > { %v1826_v62 = vpop.f32.mrf.mxu0 }
 0x362   : > { %v825_v63 = vpop.f32.mrf.mxu0 }
 0x363   : > { %1018 = vrot.lane.b32.xlu0 %v825_v63, %s1942_s28  ;;  %929 = vrot.lane.b32.xlu1 %v825_v63, %s1943_s25 }
 0x364   : > { %1780 = vmatmul.mubr.msk.f32.vlgmr.msra.gmra.mxu1 %vm838_vm12, %v825_v63 }
 0x365   : > { %922 = vmatprep.mubr.f32.mxu1 %v1940_v21  ;;  %1783 = vmatpush1.msk.msra.mxu1 %vm845_vm0, %v836_v56  ;;  %vm1022_vm0 = vcmask 121856  }
 0x366   : > { %967 = vmatprep.subr.mxu1 %v835_v12 }
 0x367   : > { %1020 = vrot.lane.b32.xlu0 %v1826_v62, %s1942_s28  ;;  %931 = vrot.lane.b32.xlu1 %v1826_v62, %s1943_s25 }
 0x368   : > { %1781 = vmatmul.mubr.msk.f32.gmra.mxu1 %vm838_vm12, %v1826_v62 }
 0x369   : > { %968 = vmatpush1.msra.mxu1 %v834_v57  ;;  %1001 = vmatprep.mubr.f32.mxu1 %v1940_v21 }
 0x36a   : > { %1790 = vmatprep.subr.msk.mxu1 %vm1027_vm11, %v1017_v59 }
 0x36b   : > { %1236 = vrot.lane.b32.xlu0 %v825_v63, %s1944_s26  ;;  %1111 = vrot.lane.b32.xlu1 %v825_v63, %s1945_s29 }
 0x36f   : > { %1238 = vrot.lane.b32.xlu0 %v1826_v62, %s1944_s26  ;;  %1113 = vrot.lane.b32.xlu1 %v1826_v62, %s1945_s29 }
 0x373   : > { %1274 = vrot.lane.b32.xlu1 %v825_v63, %s1946_s30  ;;  %1213 = vperm.xlu0 %1902, %v2097_v19  }
 0x377   : > { %1276 = vrot.lane.b32.xlu1 %v1826_v62, %s1946_s30 }
 0x37b   : > { %1209 = vperm.xlu1 %1903, %v2102_v39  }
 0x3d5   : > { %v1019_v0 = vpop.permute.xlu0 %1018  ;;  %v930_v1 = vpop.permute.xlu1 %929 }
 0x3d6   : > { %1784 = vmatmul.mubr.msk.f32.vlgmr.msra.gmra.mxu1 %vm838_vm12, %v930_v1  ;;  %1788 = vmatmul.mubr.msk.f32.vlgmr.msra.gmra.mxu0 %vm1022_vm0, %v1019_v0  ;;  %v1672_v1 = vld [vmem:[%s2307_s0 + $0x3] sm:$0x1] }
 0x3d7   : > { %1104 = vmatprep.mubr.f32.mxu0 %v1940_v21  ;;  %1007 = vmatprep.mubr.f32.mxu1 %v1940_v21 }
 0x3d8   : > { %1791 = vmatpush1.msk.msra.mxu1 %vm1027_vm11, %v1016_v60 }
 0x3d9   : > { %v1021_v2 = vpop.permute.xlu0 %1020  ;;  %v932_v3 = vpop.permute.xlu1 %931  ;;  %1149 = vmatprep.subr.mxu1 %v1015_v61 }
 0x3da   : > { %1785 = vmatmul.mubr.msk.f32.gmra.mxu1 %vm838_vm12, %v932_v3  ;;  %1789 = vmatmul.mubr.msk.f32.gmra.mxu0 %vm1022_vm0, %v1021_v2  ;;  %v1673_v2 = vmul.f32 %v1672_v1, %v1672_v1 }
 0x3db   : > { %1150 = vmatpush1.msra.mxu1 %v1014_v49  ;;  %1183 = vmatprep.mubr.f32.mxu1 %v1940_v21 }
 0x3dc   : > { %1383 = vmatprep.mubr.f32.mxu0 %v1940_v21  ;;  %v1675_v3 = vsel %vm1674_vm14, %v1673_v2, 0.0 }
 0x3dd   : > { %v1237_v19 = vpop.permute.xlu0 %1236  ;;  %v1112_v39 = vpop.permute.xlu1 %1111 }
 0x3de   : > { %1242 = vxpose.xlu1.b32.start [1/2] (short) (narrow) %v1237_v19, 16  ;;  %1792 = vmatmul.mubr.msk.f32.vlgmr.msra.gmra.mxu1 %vm1022_vm0, %v1112_v39 }
 0x3df   : > { %1189 = vmatprep.mubr.f32.mxu1 %v1940_v21 }
 0x3e1   : > { %v1239_v4 = vpop.permute.xlu0 %1238  ;;  %v1114_v5 = vpop.permute.xlu1 %1113 }
 0x3e2   : > { %1243 = vxpose.xlu1.b32.end [2/2] (short) (narrow) %v1239_v4, 16  ;;  %1793 = vmatmul.mubr.msk.f32.gmra.mxu1 %vm1022_vm0, %v1114_v5 }
 0x3e3   : > { %1466 = vmatprep.mubr.f32.mxu1 %v1940_v21 }
 0x3e5   : > { %v1275_v6 = vpop.permute.xlu1 %1274 }
 0x3e6   : > { %1280 = vxpose.xlu0.b32.start [1/2] (short) (narrow) %v1275_v6, 16 }
 0x3e9   : > { %v1277_v9 = vpop.permute.xlu1 %1276 }
 0x3ea   : > { %1281 = vxpose.xlu0.b32.end [2/2] (short) (narrow) %v1277_v9, 16 }
 0x3ee   : > { %v1214_v52 = vpop.permute.xlu0 %1213 }
 0x3f6   : > { %v1210_v8 = vpop.permute.xlu1 %1209 }
 0x409   : > { %1676 = vadd.xlane.f32.xlu1 %v1675_v3 }
 0x424   : > { %v918_v10 = vpop.f32.mrf.mxu1 }
 0x426   : > { %v920_v11 = vpop.f32.mrf.mxu1 }
 0x428   : > { %v924_v13 = vpop.f32.mrf.mxu1 }
 0x42a   : > { %v926_v14 = vpop.f32.mrf.mxu1 }
 0x45a   : > { %v1258_v62 = vpop.trf.xlu1 }
 0x45e   : > { %v1259_v0 = vpop.trf.xlu1 }
 0x462   : > { %v1296_v49 = vpop.trf.xlu0 }
 0x466   : > { %v1297_v63 = vpop.trf.xlu0 }
 0x496   : > { %v1003_v15 = vpop.f32.mrf.mxu1  ;;  %v1100_v16 = vpop.f32.mrf.mxu0 }
 0x497   : > { %v1196_v44 = vmul.f32 %v1100_v16, %v918_v10  ;;  %v1224_v45 = vmul.f32 %v1100_v16, %v1003_v15 }
 0x498   : > { %v1005_v18 = vpop.f32.mrf.mxu1  ;;  %v1102_v20 = vpop.f32.mrf.mxu0 }
 0x499   : > { %v1197_v27 = vmul.f32 %v1102_v20, %v920_v11  ;;  %v1225_v28 = vmul.f32 %v1102_v20, %v1005_v18 }
 0x49a   : > { %v1009_v23 = vpop.f32.mrf.mxu1  ;;  %v1106_v25 = vpop.f32.mrf.mxu0 }
 0x49b   : > { %v1198_v31 = vmul.f32 %v1106_v25, %v924_v13  ;;  %v1226_v33 = vmul.f32 %v1106_v25, %v1009_v23 }
 0x49c   : > { %v1011_v24 = vpop.f32.mrf.mxu1  ;;  %v1108_v29 = vpop.f32.mrf.mxu0 }
 0x49d   : > { %v1199_v40 = vmul.f32 %v1108_v29, %v926_v14  ;;  %v1227_v41 = vmul.f32 %v1108_v29, %v1011_v24 }
 0x49e   : > { %v1185_v26 = vpop.f32.mrf.mxu1 }
 0x49f   : > { %v1200_v36 = vmul.f32 %v1185_v26, %v1003_v15  ;;  %v1220_v22 = vmul.f32 %v1185_v26, %v918_v10 }
 0x4a0   : > { %v1187_v7 = vpop.f32.mrf.mxu1 }
 0x4a1   : > { %v1201_v34 = vmul.f32 %v1187_v7, %v1005_v18  ;;  %v1221_v35 = vmul.f32 %v1187_v7, %v920_v11  ;;  %v1204_v53 = vsub.f32 %v1196_v44, %v1200_v36  ;;  %v1228_v54 = vadd.f32 %v1224_v45, %v1220_v22 }
 0x4a2   : > { %v1191_v30 = vpop.f32.mrf.mxu1 }
 0x4a3   : > { %v1202_v37 = vmul.f32 %v1191_v30, %v1009_v23  ;;  %v1222_v38 = vmul.f32 %v1191_v30, %v924_v13  ;;  %v1205_v47 = vsub.f32 %v1197_v27, %v1201_v34  ;;  %v1229_v48 = vadd.f32 %v1225_v28, %v1221_v35  ;;  %v1650_v34 = vld [vmem:[%s2314_s7 + $0x8] sm:$0xff] }
 0x4a4   : > { %v1193_v17 = vpop.f32.mrf.mxu1  ;;  %v1216_v60 = vmul.f32 %v1210_v8, %v1204_v53  ;;  %v1232_v61 = vmul.f32 %v1228_v54, %v1210_v8 }
 0x4a5   : > { %v1203_v42 = vmul.f32 %v1193_v17, %v1011_v24  ;;  %v1223_v43 = vmul.f32 %v1193_v17, %v926_v14  ;;  %v1206_v32 = vsub.f32 %v1198_v31, %v1202_v37  ;;  %v1230_v46 = vadd.f32 %v1226_v33, %v1222_v38  ;;  %v1649_v37 = vld [vmem:[%s2314_s7] sm:$0xff] }
 0x4a6   : > { %v1217_v58 = vmul.f32 %v1210_v8, %v1205_v47  ;;  %v1233_v59 = vmul.f32 %v1229_v48, %v1210_v8 }
 0x4a7   : > { %v1207_v50 = vsub.f32 %v1199_v40, %v1203_v42  ;;  %v1231_v51 = vadd.f32 %v1227_v41, %v1223_v43  ;;  %v1218_v12 = vmul.f32 %v1214_v52, %v1206_v32  ;;  %v1234_v57 = vmul.f32 %v1230_v46, %v1214_v52  ;;  %v1651_v41 = vld [vmem:[%s2314_s7 + $0x10] sm:$0xff]  ;;  %v1652_v46 = vld [vmem:[%s2314_s7 + $0x18] sm:$0xff] }
 0x4a9   : > { %v1219_v55 = vmul.f32 %v1214_v52, %v1207_v50  ;;  %v1235_v56 = vmul.f32 %v1231_v51, %v1214_v52 }
 0x4ab   : > { %1347 = vmatprep.subr.mxu0 %v1219_v55  ;;  %1430 = vmatprep.subr.mxu1 %v1235_v56 }
 0x4ac   : > { %1348 = vmatpush1.msra.mxu0 %v1218_v12  ;;  %1431 = vmatpush1.msra.mxu1 %v1234_v57 }
 0x4ad   : > { %1349 = vmatprep.subr.mxu0 %v1217_v58  ;;  %1432 = vmatprep.subr.mxu1 %v1233_v59 }
 0x4ae   : > { %1350 = vmatpush1.msra.mxu0 %v1216_v60  ;;  %1433 = vmatpush1.msra.mxu1 %v1232_v61 }
 0x4af   : > { %1794 = vmatmul.mubr.msk.f32.vlgmr.msra.gmra.mxu0 %vm1312_vm13, %v1258_v62  ;;  %1796 = vmatmul.mubr.msk.f32.vlgmr.msra.gmra.mxu1 %vm1312_vm13, %v1296_v49 }
 0x4b0   : > { %1511 = vmatprep.subr.mxu0 %v1235_v56  ;;  %1588 = vmatprep.subr.mxu1 %v1219_v55  ;;  %v1677_v55 = vpop.xlane.xlu1 %1676 }
 0x4b1   : > { %1512 = vmatpush1.msra.mxu0 %v1234_v57  ;;  %1589 = vmatpush1.msra.mxu1 %v1218_v12  ;;  %v1678_v56 = vrot.slane %v1677_v55, 4 }
 0x4b2   : > { %1513 = vmatprep.subr.mxu0 %v1233_v59  ;;  %1590 = vmatprep.subr.mxu1 %v1217_v58 }
 0x4b3   : > { %1389 = vmatprep.mubr.f32.mxu0 %v1940_v21  ;;  %1472 = vmatprep.mubr.f32.mxu1 %v1940_v21  ;;  %v1679_v12 = vadd.f32 %v1678_v56, %v1677_v55 }
 0x4b4   : > { %1514 = vmatpush1.msra.mxu0 %v1232_v61  ;;  %1591 = vmatpush1.msra.mxu1 %v1216_v60 }
 0x4b5   : > { %1795 = vmatmul.mubr.msk.f32.gmra.mxu0 %vm1312_vm13, %v1259_v0  ;;  %1797 = vmatmul.mubr.msk.f32.gmra.mxu1 %vm1312_vm13, %v1297_v63  ;;  %v1680_v57 = vrot.slane %v1679_v12, 2 }
 0x4b6   : > { %1547 = vmatprep.mubr.f32.mxu0 %v1940_v21  ;;  %1624 = vmatprep.mubr.f32.mxu1 %v1940_v21 }
 0x4b7   : > { %v1681_v61 = vadd.f32 %v1680_v57, %v1679_v12 }
 0x4b9   : > { %1798 = vmatmul.mubr.msk.f32.vlgmr.msra.gmra.mxu0 %vm1312_vm13, %v1258_v62  ;;  %1800 = vmatmul.mubr.msk.f32.vlgmr.msra.gmra.mxu1 %vm1312_vm13, %v1296_v49 }
 0x4ba   : > { %1553 = vmatprep.mubr.f32.mxu0 %v1940_v21  ;;  %1630 = vmatprep.mubr.f32.mxu1 %v1940_v21 }
 0x4bd   : > { %1799 = vmatmul.mubr.msk.f32.gmra.mxu0 %vm1312_vm13, %v1259_v0  ;;  %1801 = vmatmul.mubr.msk.f32.gmra.mxu1 %vm1312_vm13, %v1297_v63  ;;  %v1682_v63 = vrot.slane %v1681_v61, 1 }
 0x4bf   : > { %v1683_v2 = vadd.f32 %v1682_v63, %v1681_v61 }
 0x56f   : > { %v1385_v19 = vpop.f32.mrf.mxu0  ;;  %v1468_v39 = vpop.f32.mrf.mxu1 }
 0x570   : > { %v1479_v11 = vsub.f32 %v1385_v19, %v1468_v39 }
 0x571   : > { %v1387_v4 = vpop.f32.mrf.mxu0  ;;  %v1470_v5 = vpop.f32.mrf.mxu1 }
 0x572   : > { %v1480_v15 = vsub.f32 %v1387_v4, %v1470_v5  ;;  %v1637_v26 = vmul.f32 %v1479_v11, %v1479_v11 }
 0x574   : > { %v1638_v28 = vmul.f32 %v1480_v15, %v1480_v15 }
 0x575   : > { %v1391_v6 = vpop.f32.mrf.mxu0  ;;  %v1474_v9 = vpop.f32.mrf.mxu1 }
 0x576   : > { %v1481_v23 = vsub.f32 %v1391_v6, %v1474_v9 }
 0x577   : > { %v1393_v10 = vpop.f32.mrf.mxu0  ;;  %v1476_v21 = vpop.f32.mrf.mxu1 }
 0x578   : > { %v1482_v29 = vsub.f32 %v1393_v10, %v1476_v21  ;;  %v1639_v22 = vmul.f32 %v1481_v23, %v1481_v23 }
 0x579   : > { %v1549_v13 = vpop.f32.mrf.mxu0  ;;  %v1626_v14 = vpop.f32.mrf.mxu1 }
 0x57a   : > { %v1627_v16 = vadd.f32 %v1626_v14, %v1549_v13  ;;  %v1640_v42 = vmul.f32 %v1482_v29, %v1482_v29 }
 0x57b   : > { %v1551_v18 = vpop.f32.mrf.mxu0  ;;  %v1628_v20 = vpop.f32.mrf.mxu1 }
 0x57c   : > { %v1641_v24 = vmul.f32 %v1627_v16, %v1627_v16  ;;  %v1629_v25 = vadd.f32 %v1628_v20, %v1551_v18 }
 0x57d   : > { %v1555_v7 = vpop.f32.mrf.mxu0  ;;  %v1632_v27 = vpop.f32.mrf.mxu1 }
 0x57e   : > { %v1642_v30 = vmul.f32 %v1629_v25, %v1629_v25  ;;  %v1633_v31 = vadd.f32 %v1632_v27, %v1555_v7  ;;  %v1645_v33 = vadd.f32 %v1641_v24, %v1637_v26 }
 0x57f   : > { %v1557_v35 = vpop.f32.mrf.mxu0  ;;  %v1634_v36 = vpop.f32.mrf.mxu1 }
 0x580   : > { %v1646_v38 = vadd.f32 %v1642_v30, %v1638_v28  ;;  %v1643_v17 = vmul.f32 %v1633_v31, %v1633_v31  ;;  %v1635_v40 = vadd.f32 %v1634_v36, %v1557_v35  ;;  %v1653_v32 = vmul.f32 %v1649_v37, %v1645_v33 }
 0x582   : > { %v1654_v43 = vmul.f32 %v1650_v34, %v1646_v38  ;;  %v1647_v44 = vadd.f32 %v1643_v17, %v1639_v22  ;;  %v1644_v45 = vmul.f32 %v1635_v40, %v1635_v40 }
 0x584   : > { %v1655_v47 = vmul.f32 %v1651_v41, %v1647_v44  ;;  %v1648_v48 = vadd.f32 %v1644_v45, %v1640_v42  ;;  %v1658_v50 = vsel %vm1657_vm15, %v1654_v43, 0.0 }
 0x585   : > { %v1659_v51 = vadd.f32 %v1658_v50, %v1653_v32 }
 0x586   : > { %v1656_v8 = vmul.f32 %v1652_v46, %v1648_v48 }
 0x587   : > { %v1660_v52 = vadd.f32 %v1659_v51, %v1655_v47 }
 0x588   : > { %v1661_v53 = vsel %vm1657_vm15, %v1656_v8, 0.0 }
 0x589   : > { %v1662_v54 = vadd.f32 %v1661_v53, %v1660_v52 }
 0x58b   : > { %1663 = vadd.xlane.f32.xlu0 %v1662_v54 }
 0x614   : > { %v1664_v58 = vpop.xlane.xlu0 %1663 }
 0x615   : > { %v1665_v59 = vrot.slane %v1664_v58, 4 }
 0x617   : > { %v1666_v60 = vadd.f32 %v1665_v59, %v1664_v58 }
 0x619   : > { %v1667_v49 = vrot.slane %v1666_v60, 2 }
 0x61b   : > { %v1668_v62 = vadd.f32 %v1667_v49, %v1666_v60 }
 0x61d   : > { %v1669_v0 = vrot.slane %v1668_v62, 1 }
 0x61f   : > { %v1670_v1 = vadd.f32 %v1669_v0, %v1668_v62 }
 0x621   : > { %1829 = vpush %v1670_v1 }
 0x622   : > { %1831 = vpush %v1683_v2 }
 0x652   : > { %s1830_s20 = spop %1829 }
 0x653   : > { %s1832_s21 = spop %1831 }
 0x654   : > { %s1685_s22 = smul.f32 -390.81714, %s1832_s21 }
 0x656   : > { %s1686_s23 = sadd.f32 %s1830_s20, %s1685_s22 }
 0x658   : > { %v1687_v3 = vstv %s1686_s23 }
 0x659   : > { %1688 = vst [vmem:[%s2026_s17] sm:$0xff] %v1687_v3 }
 0x65a PF: > { %s19_s27 = sadd.s32 1, %s1929_s27  }
 0x65b   : > { %p16_p3 = scmp.ge.s32.totalorder %s19_s27, 4  }
 0x65d   :  { %18 = sbr.rel (!%p16_p3) target bundleno = 1 (0x1), region = 92 }
 0x662   :  { %1708 = vsyncpa [#allocation3], 1 }
 0x663   :  { %1710 = vsyncpa [#allocation3 + $0x1], 1 }

</bundles_post_ra>
